<compile_context>
chip_gen: v7x
topology: tpu7x:2x2x1
jax: 0.10.0
libtpu: 0.0.40
codegen_flags: <defaults>
</compile_context>

<pallas_src>
import math

import jax
import jax.numpy as jnp
from jax.experimental import pallas as pl
from jax.experimental.pallas import tpu as pltpu

# ----------------------------- tiny LLaMA-3 config --------------------------
VOCAB      = 256
SEQ        = 8
D_MODEL    = 128                     # lane-dense (multiple of 128)
N_HEADS    = 4
N_KV_HEADS = 2                       # grouped-query attention, like LLaMA-3
HEAD_DIM   = D_MODEL // N_HEADS      # 32
GROUP      = N_HEADS // N_KV_HEADS   # 2
FFN_DIM    = 256
N_LAYERS   = 2
RMS_EPS    = 1e-5
ROPE_THETA = 500000.0                # LLaMA-3 rope base


# ----------------------------- in-kernel helpers ----------------------------
def _rmsnorm(x, w):
    # x: [S, D] f32, w: [1, D] f32  (elementwise math kept in f32 -> v5e-safe)
    var = jnp.mean(x * x, axis=-1, keepdims=True)
    return x * jax.lax.rsqrt(var + RMS_EPS) * w


def _apply_rope_full(x, cos_f, sin_signed_f):
    """RoPE on a full-width [S, n_heads*HEAD_DIM] array.

    rotate_half within each HEAD_DIM block is done with two XLU lane rolls and
    a per-half-block select; the (-x2, x1) sign is pre-folded into
    sin_signed_f, so there is no negate / lane slice / concatenate.
    """
    half = HEAD_DIM // 2
    w = x.shape[-1]
    lane = jax.lax.broadcasted_iota(jnp.int32, x.shape, 1)
    first_half = (lane % HEAD_DIM) < half
    # NOTE: pltpu.roll requires a non-negative axis (axis=1 == lane axis here).
    rot = jnp.where(first_half,
                    pltpu.roll(x, shift=w - half, axis=1),    # -> x[j + half]
                    pltpu.roll(x, shift=half, axis=1))        # -> x[j - half]
    return x * cos_f + rot * sin_signed_f


# ----------------------------- fused forward kernel --------------------------
def fused_forward_kernel(x0_ref, cos_ref, sin_ref,
                         wqkv_ref, wo_ref, wgu_ref, wd_ref,
                         attn_norm_ref, ffn_norm_ref,
                         final_norm_ref, lm_head_ref,
                         logits_ref, x_scr):
    """grid=(N_LAYERS,): one decoder layer per grid step; the residual stream
    stays in VMEM scratch; last step also runs final norm + LM head (decode
    position only)."""
    l = pl.program_id(0)

    @pl.when(l == 0)
    def _():
        x_scr[...] = x0_ref[...]                      # load embeddings once

    x = x_scr[...]                                    # [S, D] f32 residual
    cos = cos_ref[...]                                # [S, D] f32
    sin_s = sin_ref[...]                              # sign-folded sin, [S, D]

    # ---- attention block (GQA, heads batched, fused QKV projection) ----
    h = _rmsnorm(x, attn_norm_ref[0]).astype(jnp.bfloat16)
    qkv = jnp.dot(h, wqkv_ref[0], preferred_element_type=jnp.float32)  # [S,3D]
    q = qkv[:, 0 * D_MODEL:1 * D_MODEL]                                # [S, D]
    k = qkv[:, 1 * D_MODEL:2 * D_MODEL]                                # kv-expanded
    v = qkv[:, 2 * D_MODEL:3 * D_MODEL]                                # kv-expanded

    q = _apply_rope_full(q, cos, sin_s)
    k = _apply_rope_full(k, cos, sin_s)

    qh = jnp.transpose(q.reshape(SEQ, N_HEADS, HEAD_DIM), (1, 0, 2))  # [H,S,hd]
    kh = jnp.transpose(k.reshape(SEQ, N_HEADS, HEAD_DIM), (1, 0, 2))
    vh = jnp.transpose(v.reshape(SEQ, N_HEADS, HEAD_DIM), (1, 0, 2))

    s = jnp.einsum("hqd,hkd->hqk", qh.astype(jnp.bfloat16),
                   kh.astype(jnp.bfloat16),
                   preferred_element_type=jnp.float32)               # [H,S,S]
    s = s * (1.0 / math.sqrt(HEAD_DIM))
    row = jax.lax.broadcasted_iota(jnp.int32, s.shape, 1)
    col = jax.lax.broadcasted_iota(jnp.int32, s.shape, 2)
    s = jnp.where(row >= col, s, jnp.float32(-1e30))                 # causal

    m = jnp.max(s, axis=-1, keepdims=True)
    p = jnp.exp(s - m)
    p = p * pl.reciprocal(jnp.sum(p, axis=-1, keepdims=True), approx=True)

    o = jnp.einsum("hqk,hkd->hqd", p.astype(jnp.bfloat16),
                   vh.astype(jnp.bfloat16),
                   preferred_element_type=jnp.float32)               # [H,S,hd]
    attn = jnp.transpose(o, (1, 0, 2)).reshape(SEQ, N_HEADS * HEAD_DIM)
    x = x + jnp.dot(attn.astype(jnp.bfloat16), wo_ref[0],
                    preferred_element_type=jnp.float32)

    # ---- SwiGLU MLP block (fused gate+up projection) ----
    h2 = _rmsnorm(x, ffn_norm_ref[0]).astype(jnp.bfloat16)
    gu = jnp.dot(h2, wgu_ref[0], preferred_element_type=jnp.float32)  # [S, 2F]
    g = gu[:, :FFN_DIM]
    u = gu[:, FFN_DIM:]
    act = (g * jax.nn.sigmoid(g)) * u                                 # SiLU(g)*u
    x = x + jnp.dot(act.astype(jnp.bfloat16), wd_ref[0],
                    preferred_element_type=jnp.float32)

    x_scr[...] = x

    # ---- final norm + LM head (decode position only, kept in f32) ----
    @pl.when(l == pl.num_programs(0) - 1)
    def _():
        x_last = x[SEQ - 1:SEQ, :]                                    # [1, D]
        hl = _rmsnorm(x_last, final_norm_ref[...])
        logits_ref[...] = jnp.dot(hl, lm_head_ref[...],
                                  preferred_element_type=jnp.float32)


# ----------------------------- wrapper ----------------------------------------
def _const2(shape):
    return pl.BlockSpec(shape, lambda l: (0, 0))


def _layer3(shape):
    return pl.BlockSpec(shape, lambda l: (l, 0, 0))


def _cost_estimate(in_arrays):
    per_layer_flops = (
        2 * SEQ * D_MODEL * (3 * D_MODEL)           # fused q, k, v projections
        + 2 * SEQ * D_MODEL * D_MODEL               # o projection
        + 2 * N_HEADS * SEQ * SEQ * HEAD_DIM * 2    # scores + p@v
        + 2 * SEQ * D_MODEL * (2 * FFN_DIM)         # fused gate + up
        + 2 * SEQ * FFN_DIM * D_MODEL               # down
    )
    flops = N_LAYERS * per_layer_flops + 2 * D_MODEL * VOCAB          # + lm head
    transcendentals = N_LAYERS * (N_HEADS * SEQ * SEQ + SEQ * FFN_DIM + SEQ)
    bytes_accessed = sum(int(a.size) * a.dtype.itemsize for a in in_arrays)
    bytes_accessed += VOCAB * 4                                       # logits out
    return pl.CostEstimate(flops=int(flops),
                           transcendentals=int(transcendentals),
                           bytes_accessed=int(bytes_accessed))


@jax.jit
def llama3_forward(token_ids, tok_emb, stacked, final_norm, lm_head,
                   cos_full, sin_signed_full):
    """Tiny-LLaMA-3 causal-LM decode forward.

    Returns (last-position logits [1, VOCAB], greedy next token).
    Embedding gather + one fused pallas_call + argmax, all under one jit.
    """
    x0 = tok_emb[token_ids]                           # [S, D] gather (glue)

    args = (x0, cos_full, sin_signed_full,
            stacked["wqkv"], stacked["wo"], stacked["wgu"], stacked["wd"],
            stacked["attn_norm"], stacked["ffn_norm"],
            final_norm, lm_head)

    in_specs = [
        _const2((SEQ, D_MODEL)),                      # x0 (read at l == 0)
        _const2((SEQ, D_MODEL)),                      # cos (full width)
        _const2((SEQ, D_MODEL)),                      # sin (sign-folded)
        _layer3((1, D_MODEL, 3 * D_MODEL)),           # wqkv [L, D, 3*H*hd]
        _layer3((1, D_MODEL, D_MODEL)),               # wo
        _layer3((1, D_MODEL, 2 * FFN_DIM)),           # wgu  [L, D, 2F]
        _layer3((1, FFN_DIM, D_MODEL)),               # wd
        _layer3((1, 1, D_MODEL)),                     # attn_norm
        _layer3((1, 1, D_MODEL)),                     # ffn_norm
        _const2((1, D_MODEL)),                        # final_norm
        _const2((D_MODEL, VOCAB)),                    # lm_head (f32)
    ]

    logits_last = pl.pallas_call(
        fused_forward_kernel,
        out_shape=jax.ShapeDtypeStruct((1, VOCAB), jnp.float32),
        grid_spec=pltpu.PrefetchScalarGridSpec(
            num_scalar_prefetch=0,
            grid=(N_LAYERS,),
            in_specs=in_specs,
            out_specs=pl.BlockSpec((1, VOCAB), lambda l: (0, 0)),
            scratch_shapes=[pltpu.VMEM((SEQ, D_MODEL), jnp.float32)],
        ),
        compiler_params=pltpu.CompilerParams(
            # layer axis is a sequential dependency -> "arbitrary".
            # (At real scale, add parallel vocab / batch grid axes for v7x.)
            dimension_semantics=("arbitrary",),
            vmem_limit_bytes=64 * 1024 * 1024,
        ),
        cost_estimate=_cost_estimate(args),
    )(*args)

    next_token = jnp.argmax(logits_last[0])
    return logits_last, next_token


# ----------------------------- parameter init --------------------------------
def init_params(key):
    def nrm(k, shape, scale=0.02):
        return scale * jax.random.normal(k, shape, dtype=jnp.float32)

    keys = jax.random.split(key, 2 + N_LAYERS)
    params = {
        "tok_emb": nrm(keys[0], (VOCAB, D_MODEL)),
        "final_norm": jnp.ones((1, D_MODEL), jnp.float32),
        "lm_head": nrm(keys[1], (D_MODEL, VOCAB)),
        "layers": [],
    }
    for li in range(N_LAYERS):
        lk = jax.random.split(keys[2 + li], 7)
        params["layers"].append({
            "wq": nrm(lk[0], (D_MODEL, N_HEADS * HEAD_DIM)),
            "wk": nrm(lk[1], (D_MODEL, N_KV_HEADS * HEAD_DIM)),
            "wv": nrm(lk[2], (D_MODEL, N_KV_HEADS * HEAD_DIM)),
            "wo": nrm(lk[3], (N_HEADS * HEAD_DIM, D_MODEL)),
            "wg": nrm(lk[4], (D_MODEL, FFN_DIM)),
            "wu": nrm(lk[5], (D_MODEL, FFN_DIM)),
            "wd": nrm(lk[6], (FFN_DIM, D_MODEL)),
            "attn_norm": jnp.ones((1, D_MODEL), jnp.float32),
            "ffn_norm": jnp.ones((1, D_MODEL), jnp.float32),
        })
    return params


def _expand_kv(w):
    # [D, KV*hd] -> [D, H*hd]: materialize GQA head sharing in the weight so
    # the kernel's K/V arrays are full 128-lane width (identical math).
    d = w.shape[0]
    w3 = w.reshape(d, N_KV_HEADS, HEAD_DIM)
    w3 = jnp.repeat(w3, GROUP, axis=1)
    return w3.reshape(d, N_HEADS * HEAD_DIM)


def stack_params(params):
    bf = jnp.bfloat16
    layers = params["layers"]
    # Fused QKV:  [L, D, 3*H*hd]  (K/V expanded to full query-head width).
    wqkv = jnp.stack([
        jnp.concatenate([l["wq"], _expand_kv(l["wk"]), _expand_kv(l["wv"])],
                        axis=-1) for l in layers])
    # Fused gate+up: [L, D, 2F].
    wgu = jnp.stack([
        jnp.concatenate([l["wg"], l["wu"]], axis=-1) for l in layers])
    return {
        "wqkv": wqkv.astype(bf),
        "wo": jnp.stack([l["wo"] for l in layers]).astype(bf),
        "wgu": wgu.astype(bf),
        "wd": jnp.stack([l["wd"] for l in layers]).astype(bf),
        "attn_norm": jnp.stack([l["attn_norm"] for l in layers]),   # f32
        "ffn_norm": jnp.stack([l["ffn_norm"] for l in layers]),     # f32
    }


def make_rope_tables(seq, head_dim, n_heads, theta):
    half = head_dim // 2
    inv_freq = 1.0 / (theta ** (jnp.arange(0, half, dtype=jnp.float32) / half))
    pos = jnp.arange(seq, dtype=jnp.float32)
    ang = pos[:, None] * inv_freq[None, :]                            # [S, half]
    cos_hd = jnp.concatenate([jnp.cos(ang), jnp.cos(ang)], axis=-1)   # [S, hd]
    sin_hd = jnp.concatenate([jnp.sin(ang), jnp.sin(ang)], axis=-1)
    # rotate_half sign (-x2, x1) folded into the sin table:
    sin_signed = jnp.concatenate([-jnp.sin(ang), jnp.sin(ang)], axis=-1)
    cos_full = jnp.tile(cos_hd, (1, n_heads))                         # [S, H*hd]
    sin_signed_full = jnp.tile(sin_signed, (1, n_heads))
    return cos_hd, sin_hd, cos_full, sin_signed_full


# ----------------------------- plain-JAX reference ----------------------------
def ref_forward(token_ids, params, cos_hd, sin_hd):
    """f32, per-head reference mirroring the HF LLaMA-3 math (for validation)."""
    def rmsnorm(x, w):
        return x * jax.lax.rsqrt(jnp.mean(x * x, -1, keepdims=True) + RMS_EPS) * w

    def rope(x):
        h = HEAD_DIM // 2
        return x * cos_hd + jnp.concatenate([-x[:, h:], x[:, :h]], -1) * sin_hd

    causal = jnp.tril(jnp.ones((SEQ, SEQ), bool))
    x = params["tok_emb"][token_ids]
    for layer in params["layers"]:
        hn = rmsnorm(x, layer["attn_norm"])
        q = hn @ layer["wq"]
        k = hn @ layer["wk"]
        v = hn @ layer["wv"]
        outs = []
        for hh in range(N_HEADS):
            kv = hh // GROUP
            qh = rope(q[:, hh * HEAD_DIM:(hh + 1) * HEAD_DIM])
            kh = rope(k[:, kv * HEAD_DIM:(kv + 1) * HEAD_DIM])
            vh = v[:, kv * HEAD_DIM:(kv + 1) * HEAD_DIM]
            s = (qh @ kh.T) / math.sqrt(HEAD_DIM)
            s = jnp.where(causal, s, -1e30)
            outs.append(jax.nn.softmax(s, axis=-1) @ vh)
        x = x + jnp.concatenate(outs, -1) @ layer["wo"]
        h2 = rmsnorm(x, layer["ffn_norm"])
        g = h2 @ layer["wg"]
        u = h2 @ layer["wu"]
        x = x + ((g * jax.nn.sigmoid(g)) * u) @ layer["wd"]
    hf = rmsnorm(x, params["final_norm"])
    return hf[SEQ - 1:SEQ, :] @ params["lm_head"]


# ----------------------------- main -------------------------------------------
if __name__ == "__main__":
    root = jax.random.PRNGKey(0)
    k_param, k_tok = jax.random.split(root)

    params = init_params(k_param)
    stacked = stack_params(params)
    cos_hd, sin_hd, cos_full, sin_signed_full = make_rope_tables(
        SEQ, HEAD_DIM, N_HEADS, ROPE_THETA)

    # "prompt": deterministic synthetic token ids standing in for the tokenizer.
    token_ids = jax.random.randint(k_tok, (SEQ,), 0, VOCAB, dtype=jnp.int32)

    logits, next_token = llama3_forward(
        token_ids, params["tok_emb"], stacked, params["final_norm"],
        params["lm_head"], cos_full, sin_signed_full)
    logits = jax.block_until_ready(logits)
    next_token = jax.block_until_ready(next_token)

    assert logits.shape == (1, VOCAB)
    assert bool(jnp.all(jnp.isfinite(logits)))

    # validate against the plain-JAX f32 reference (loose tol: bf16 MXU + approx
    # reciprocal in the kernel).
    ref = ref_forward(token_ids, params, cos_hd, sin_hd)
    assert bool(jnp.allclose(logits, ref, atol=7e-2, rtol=7e-2)), \
        float(jnp.max(jnp.abs(logits - ref)))

    _ = int(next_token)   # greedy decode step (stands in for model.generate)
    print("KERNEL_OK")
</pallas_src>

<mosaic_0001>
module attributes {stable_mosaic.version = 11 : i64} {
  func.func @fused_forward_kernel(%arg0: i32, %arg1: memref<8x128xf32, #tpu.memory_space<vmem>>, %arg2: memref<8x128xf32, #tpu.memory_space<vmem>>, %arg3: memref<8x128xf32, #tpu.memory_space<vmem>>, %arg4: memref<1x128x384xbf16, #tpu.memory_space<vmem>>, %arg5: memref<1x128x128xbf16, #tpu.memory_space<vmem>>, %arg6: memref<1x128x512xbf16, #tpu.memory_space<vmem>>, %arg7: memref<1x256x128xbf16, #tpu.memory_space<vmem>>, %arg8: memref<1x1x128xf32, #tpu.memory_space<vmem>>, %arg9: memref<1x1x128xf32, #tpu.memory_space<vmem>>, %arg10: memref<1x128xf32, #tpu.memory_space<vmem>>, %arg11: memref<128x256xf32, #tpu.memory_space<vmem>>, %arg12: memref<1x256xf32, #tpu.memory_space<vmem>>, %arg13: memref<8x128xf32, #tpu.memory_space<vmem>>) attributes {dimension_semantics = [#tpu.dimension_semantics<arbitrary>], iteration_bounds = array<i64: 2>, scalar_prefetch = 0 : i64, scratch_operands = 1 : i64, tpu.core_type = #tpu.core_type<tc>, window_params = [{pipeline_mode = #tpu.pipeline_mode<synchronous>, transform_indices = @transform_0, window_bounds = array<i64: 8, 128>}, {pipeline_mode = #tpu.pipeline_mode<synchronous>, transform_indices = @transform_1, window_bounds = array<i64: 8, 128>}, {pipeline_mode = #tpu.pipeline_mode<synchronous>, transform_indices = @transform_2, window_bounds = array<i64: 8, 128>}, {transform_indices = @transform_3, window_bounds = array<i64: 1, 128, 384>}, {transform_indices = @transform_4, window_bounds = array<i64: 1, 128, 128>}, {transform_indices = @transform_5, window_bounds = array<i64: 1, 128, 512>}, {transform_indices = @transform_6, window_bounds = array<i64: 1, 256, 128>}, {transform_indices = @transform_7, window_bounds = array<i64: 1, 1, 128>}, {transform_indices = @transform_8, window_bounds = array<i64: 1, 1, 128>}, {pipeline_mode = #tpu.pipeline_mode<synchronous>, transform_indices = @transform_9, window_bounds = array<i64: 1, 128>}, {pipeline_mode = #tpu.pipeline_mode<synchronous>, transform_indices = @transform_10, window_bounds = array<i64: 128, 256>}, {pipeline_mode = #tpu.pipeline_mode<synchronous>, transform_indices = @transform_11, window_bounds = array<i64: 1, 256>}]} {
    %c0_i32 = arith.constant 0 : i32
    %0 = arith.cmpi eq, %arg0, %c0_i32 : i32
    %1 = arith.extui %0 : i1 to i32
    %c0_i32_0 = arith.constant 0 : i32
    %2 = arith.cmpi ne, %1, %c0_i32_0 : i32
    scf.if %2 {
      %c0_58 = arith.constant 0 : index
      %c0_59 = arith.constant 0 : index
      %149 = vector.load %arg1[%c0_58, %c0_59] : memref<8x128xf32, #tpu.memory_space<vmem>>, vector<8x128xf32>
      %c0_60 = arith.constant 0 : index
      %c0_61 = arith.constant 0 : index
      %150 = vector.load %arg13[%c0_60, %c0_61] : memref<8x128xf32, #tpu.memory_space<vmem>>, vector<8x128xf32>
      tpu.vector_store %arg13[%c0_60, %c0_61], %149 {strides = array<i32>} : memref<8x128xf32, #tpu.memory_space<vmem>>, vector<8x128xf32>,
    } else {
    }
    %c0 = arith.constant 0 : index
    %c0_1 = arith.constant 0 : index
    %3 = vector.load %arg13[%c0, %c0_1] : memref<8x128xf32, #tpu.memory_space<vmem>>, vector<8x128xf32>
    %c0_2 = arith.constant 0 : index
    %c0_3 = arith.constant 0 : index
    %4 = vector.load %arg2[%c0_2, %c0_3] : memref<8x128xf32, #tpu.memory_space<vmem>>, vector<8x128xf32>
    %c0_4 = arith.constant 0 : index
    %c0_5 = arith.constant 0 : index
    %5 = vector.load %arg3[%c0_4, %c0_5] : memref<8x128xf32, #tpu.memory_space<vmem>>, vector<8x128xf32>
    %c0_6 = arith.constant 0 : index
    %c0_7 = arith.constant 0 : index
    %c0_8 = arith.constant 0 : index
    %6 = vector.load %arg8[%c0_6, %c0_7, %c0_8] : memref<1x1x128xf32, #tpu.memory_space<vmem>>, vector<1x1x128xf32>
    %7 = vector.shape_cast %6 : vector<1x1x128xf32> to vector<1x128xf32>
    %8 = arith.mulf %3, %3 : vector<8x128xf32>
    %cst = arith.constant dense<0.000000e+00> : vector<8xf32>
    %9 = vector.multi_reduction <add>, %8, %cst [1] : vector<8x128xf32> to vector<8xf32>
    %10 = vector.shape_cast %9 : vector<8xf32> to vector<8x1xf32>
    %cst_9 = arith.constant 1.280000e+02 : f32
    %11 = vector.broadcast %cst_9 : f32 to vector<8x1xf32>
    %12 = arith.divf %10, %11 : vector<8x1xf32>
    %cst_10 = arith.constant 9.99999974E-6 : f32
    %13 = vector.broadcast %cst_10 : f32 to vector<8x1xf32>
    %14 = arith.addf %12, %13 : vector<8x1xf32>
    %15 = math.rsqrt %14 : vector<8x1xf32>
    %16 = vector.broadcast %15 : vector<8x1xf32> to vector<8x128xf32>
    %17 = arith.mulf %3, %16 : vector<8x128xf32>
    %18 = vector.broadcast %7 : vector<1x128xf32> to vector<8x128xf32>
    %19 = arith.mulf %17, %18 : vector<8x128xf32>
    %20 = arith.truncf %19 : vector<8x128xf32> to vector<8x128xbf16>
    %c0_11 = arith.constant 0 : index
    %c0_12 = arith.constant 0 : index
    %c0_13 = arith.constant 0 : index
    %21 = vector.load %arg4[%c0_11, %c0_12, %c0_13] : memref<1x128x384xbf16, #tpu.memory_space<vmem>>, vector<1x128x384xbf16>
    %22 = vector.shape_cast %21 : vector<1x128x384xbf16> to vector<128x384xbf16>
    %cst_14 = arith.constant dense<0.000000e+00> : vector<8x384xf32>
    %23 = tpu.matmul %20, %22, %cst_14 {dimension_numbers = #tpu.dot_dimension_numbers<[1], [0], [0], [1], [0, 0, 1, 1], [], []>} : vector<8x128xbf16>, vector<128x384xbf16>, vector<8x384xf32> -> vector<8x384xf32>
    %24 = vector.extract_strided_slice %23 {offsets = [0, 0], sizes = [8, 128], strides = [1, 1]} : vector<8x384xf32> to vector<8x128xf32>
    %25 = vector.extract_strided_slice %23 {offsets = [0, 128], sizes = [8, 128], strides = [1, 1]} : vector<8x384xf32> to vector<8x128xf32>
    %26 = vector.extract_strided_slice %23 {offsets = [0, 256], sizes = [8, 128], strides = [1, 1]} : vector<8x384xf32> to vector<8x128xf32>
    %27 = tpu.iota {dimensions = array<i32: 1>} : vector<8x128xi32>
    %c32_i32 = arith.constant 32 : i32
    %c0_i32_15 = arith.constant 0 : i32
    %28 = arith.cmpi eq, %c32_i32, %c0_i32_15 : i32
    %c1_i32 = arith.constant 1 : i32
    %29 = arith.select %28, %c1_i32, %c32_i32 : i32
    %30 = vector.broadcast %29 : i32 to vector<8x128xi32>
    %31 = arith.remsi %27, %30 : vector<8x128xi32>
    %c0_i32_16 = arith.constant 0 : i32
    %32 = vector.broadcast %c0_i32_16 : i32 to vector<8x128xi32>
    %33 = arith.cmpi ne, %31, %32 : vector<8x128xi32>
    %c0_i32_17 = arith.constant 0 : i32
    %34 = vector.broadcast %c0_i32_17 : i32 to vector<8x128xi32>
    %35 = arith.cmpi slt, %31, %34 : vector<8x128xi32>
    %c0_i32_18 = arith.constant 0 : i32
    %36 = arith.cmpi slt, %29, %c0_i32_18 : i32
    %37 = vector.broadcast %36 : i1 to vector<8x128xi1>
    %38 = vector.broadcast %37 : vector<8x128xi1> to vector<8x128xi1>
    %39 = arith.xori %35, %38 : vector<8x128xi1>
    %40 = arith.andi %39, %33 : vector<8x128xi1>
    %41 = vector.broadcast %29 : i32 to vector<8x128xi32>
    %42 = arith.addi %31, %41 : vector<8x128xi32>
    %43 = arith.select %40, %42, %31 : vector<8x128xi1>, vector<8x128xi32>
    %c16_i32 = arith.constant 16 : i32
    %44 = vector.broadcast %c16_i32 : i32 to vector<8x128xi32>
    %45 = arith.cmpi slt, %43, %44 : vector<8x128xi32>
    %c112_i32 = arith.constant 112 : i32
    %46 = tpu.dynamic_rotate %24 by %c112_i32 dim 1 : vector<8x128xf32>, i32 -> vector<8x128xf32>
    %c16_i32_19 = arith.constant 16 : i32
    %47 = tpu.dynamic_rotate %24 by %c16_i32_19 dim 1 : vector<8x128xf32>, i32 -> vector<8x128xf32>
    %48 = arith.select %45, %46, %47 : vector<8x128xi1>, vector<8x128xf32>
    %49 = arith.mulf %24, %4 : vector<8x128xf32>
    %50 = arith.mulf %48, %5 : vector<8x128xf32>
    %51 = arith.addf %49, %50 : vector<8x128xf32>
    %52 = tpu.iota {dimensions = array<i32: 1>} : vector<8x128xi32>
    %c32_i32_20 = arith.constant 32 : i32
    %c0_i32_21 = arith.constant 0 : i32
    %53 = arith.cmpi eq, %c32_i32_20, %c0_i32_21 : i32
    %c1_i32_22 = arith.constant 1 : i32
    %54 = arith.select %53, %c1_i32_22, %c32_i32_20 : i32
    %55 = vector.broadcast %54 : i32 to vector<8x128xi32>
    %56 = arith.remsi %52, %55 : vector<8x128xi32>
    %c0_i32_23 = arith.constant 0 : i32
    %57 = vector.broadcast %c0_i32_23 : i32 to vector<8x128xi32>
    %58 = arith.cmpi ne, %56, %57 : vector<8x128xi32>
    %c0_i32_24 = arith.constant 0 : i32
    %59 = vector.broadcast %c0_i32_24 : i32 to vector<8x128xi32>
    %60 = arith.cmpi slt, %56, %59 : vector<8x128xi32>
    %c0_i32_25 = arith.constant 0 : i32
    %61 = arith.cmpi slt, %54, %c0_i32_25 : i32
    %62 = vector.broadcast %61 : i1 to vector<8x128xi1>
    %63 = vector.broadcast %62 : vector<8x128xi1> to vector<8x128xi1>
    %64 = arith.xori %60, %63 : vector<8x128xi1>
    %65 = arith.andi %64, %58 : vector<8x128xi1>
    %66 = vector.broadcast %54 : i32 to vector<8x128xi32>
    %67 = arith.addi %56, %66 : vector<8x128xi32>
    %68 = arith.select %65, %67, %56 : vector<8x128xi1>, vector<8x128xi32>
    %c16_i32_26 = arith.constant 16 : i32
    %69 = vector.broadcast %c16_i32_26 : i32 to vector<8x128xi32>
    %70 = arith.cmpi slt, %68, %69 : vector<8x128xi32>
    %c112_i32_27 = arith.constant 112 : i32
    %71 = tpu.dynamic_rotate %25 by %c112_i32_27 dim 1 : vector<8x128xf32>, i32 -> vector<8x128xf32>
    %c16_i32_28 = arith.constant 16 : i32
    %72 = tpu.dynamic_rotate %25 by %c16_i32_28 dim 1 : vector<8x128xf32>, i32 -> vector<8x128xf32>
    %73 = arith.select %70, %71, %72 : vector<8x128xi1>, vector<8x128xf32>
    %74 = arith.mulf %25, %4 : vector<8x128xf32>
    %75 = arith.mulf %73, %5 : vector<8x128xf32>
    %76 = arith.addf %74, %75 : vector<8x128xf32>
    %77 = vector.shape_cast %51 : vector<8x128xf32> to vector<8x4x32xf32>
    %78 = tpu.transpose %77, [1, 0, 2] : vector<8x4x32xf32> -> vector<4x8x32xf32>
    %79 = vector.shape_cast %76 : vector<8x128xf32> to vector<8x4x32xf32>
    %80 = tpu.transpose %79, [1, 0, 2] : vector<8x4x32xf32> -> vector<4x8x32xf32>
    %81 = vector.shape_cast %26 : vector<8x128xf32> to vector<8x4x32xf32>
    %82 = tpu.transpose %81, [1, 0, 2] : vector<8x4x32xf32> -> vector<4x8x32xf32>
    %83 = arith.truncf %78 : vector<4x8x32xf32> to vector<4x8x32xbf16>
    %84 = arith.truncf %80 : vector<4x8x32xf32> to vector<4x8x32xbf16>
    "tpu.trace_start"() <{level = 10 : i32, message = "hqd,hkd->hqk"}> : () -> ()
    %cst_29 = arith.constant dense<0.000000e+00> : vector<4x8x8xf32>
    %85 = tpu.matmul %83, %84, %cst_29 {dimension_numbers = #tpu.dot_dimension_numbers<[2], [2], [1], [1], [0, 0, 0, 1, 1, 1], [0], [0]>} : vector<4x8x32xbf16>, vector<4x8x32xbf16>, vector<4x8x8xf32> -> vector<4x8x8xf32>
    "tpu.trace_stop"() : () -> ()
    %cst_30 = arith.constant 0.176776692 : f32
    %86 = vector.broadcast %cst_30 : f32 to vector<4x8x8xf32>
    %87 = arith.mulf %85, %86 : vector<4x8x8xf32>
    %88 = tpu.iota {dimensions = array<i32: 1>} : vector<4x8x8xi32>
    %89 = tpu.iota {dimensions = array<i32: 2>} : vector<4x8x8xi32>
    %90 = arith.cmpi sge, %88, %89 : vector<4x8x8xi32>
    %cst_31 = arith.constant -1.000000e+30 : f32
    %91 = vector.broadcast %cst_31 : f32 to vector<4x8x8xf32>
    %92 = arith.select %90, %87, %91 : vector<4x8x8xi1>, vector<4x8x8xf32>
    %cst_32 = arith.constant dense<0xFF800000> : vector<4x8xf32>
    %93 = vector.multi_reduction <maximumf>, %92, %cst_32 [2] : vector<4x8x8xf32> to vector<4x8xf32>
    %94 = vector.shape_cast %93 : vector<4x8xf32> to vector<4x8x1xf32>
    %95 = vector.broadcast %94 : vector<4x8x1xf32> to vector<4x8x8xf32>
    %96 = arith.subf %92, %95 : vector<4x8x8xf32>
    %97 = math.exp %96 : vector<4x8x8xf32>
    %cst_33 = arith.constant dense<0.000000e+00> : vector<4x8xf32>
    %98 = vector.multi_reduction <add>, %97, %cst_33 [2] : vector<4x8x8xf32> to vector<4x8xf32>
    %99 = vector.shape_cast %98 : vector<4x8xf32> to vector<4x8x1xf32>
    %100 = tpu.reciprocal %99 {approx = true} : vector<4x8x1xf32> -> vector<4x8x1xf32>
    %101 = vector.broadcast %100 : vector<4x8x1xf32> to vector<4x8x8xf32>
    %102 = arith.mulf %97, %101 : vector<4x8x8xf32>
    %103 = arith.truncf %102 : vector<4x8x8xf32> to vector<4x8x8xbf16>
    %104 = arith.truncf %82 : vector<4x8x32xf32> to vector<4x8x32xbf16>
    "tpu.trace_start"() <{level = 10 : i32, message = "hqk,hkd->hqd"}> : () -> ()
    %cst_34 = arith.constant dense<0.000000e+00> : vector<4x8x32xf32>
    %105 = tpu.matmul %103, %104, %cst_34 {dimension_numbers = #tpu.dot_dimension_numbers<[2], [1], [1], [2], [0, 0, 0, 1, 1, 2], [0], [0]>} : vector<4x8x8xbf16>, vector<4x8x32xbf16>, vector<4x8x32xf32> -> vector<4x8x32xf32>
    "tpu.trace_stop"() : () -> ()
    %106 = tpu.transpose %105, [1, 0, 2] : vector<4x8x32xf32> -> vector<8x4x32xf32>
    %107 = vector.shape_cast %106 : vector<8x4x32xf32> to vector<8x128xf32>
    %108 = arith.truncf %107 : vector<8x128xf32> to vector<8x128xbf16>
    %c0_35 = arith.constant 0 : index
    %c0_36 = arith.constant 0 : index
    %c0_37 = arith.constant 0 : index
    %109 = vector.load %arg5[%c0_35, %c0_36, %c0_37] : memref<1x128x128xbf16, #tpu.memory_space<vmem>>, vector<1x128x128xbf16>
    %110 = vector.shape_cast %109 : vector<1x128x128xbf16> to vector<128x128xbf16>
    %cst_38 = arith.constant dense<0.000000e+00> : vector<8x128xf32>
    %111 = tpu.matmul %108, %110, %cst_38 {dimension_numbers = #tpu.dot_dimension_numbers<[1], [0], [0], [1], [0, 0, 1, 1], [], []>} : vector<8x128xbf16>, vector<128x128xbf16>, vector<8x128xf32> -> vector<8x128xf32>
    %112 = arith.addf %3, %111 : vector<8x128xf32>
    %c0_39 = arith.constant 0 : index
    %c0_40 = arith.constant 0 : index
    %c0_41 = arith.constant 0 : index
    %113 = vector.load %arg9[%c0_39, %c0_40, %c0_41] : memref<1x1x128xf32, #tpu.memory_space<vmem>>, vector<1x1x128xf32>
    %114 = vector.shape_cast %113 : vector<1x1x128xf32> to vector<1x128xf32>
    %115 = arith.mulf %112, %112 : vector<8x128xf32>
    %cst_42 = arith.constant dense<0.000000e+00> : vector<8xf32>
    %116 = vector.multi_reduction <add>, %115, %cst_42 [1] : vector<8x128xf32> to vector<8xf32>
    %117 = vector.shape_cast %116 : vector<8xf32> to vector<8x1xf32>
    %cst_43 = arith.constant 1.280000e+02 : f32
    %118 = vector.broadcast %cst_43 : f32 to vector<8x1xf32>
    %119 = arith.divf %117, %118 : vector<8x1xf32>
    %cst_44 = arith.constant 9.99999974E-6 : f32
    %120 = vector.broadcast %cst_44 : f32 to vector<8x1xf32>
    %121 = arith.addf %119, %120 : vector<8x1xf32>
    %122 = math.rsqrt %121 : vector<8x1xf32>
    %123 = vector.broadcast %122 : vector<8x1xf32> to vector<8x128xf32>
    %124 = arith.mulf %112, %123 : vector<8x128xf32>
    %125 = vector.broadcast %114 : vector<1x128xf32> to vector<8x128xf32>
    %126 = arith.mulf %124, %125 : vector<8x128xf32>
    %127 = arith.truncf %126 : vector<8x128xf32> to vector<8x128xbf16>
    %c0_45 = arith.constant 0 : index
    %c0_46 = arith.constant 0 : index
    %c0_47 = arith.constant 0 : index
    %128 = vector.load %arg6[%c0_45, %c0_46, %c0_47] : memref<1x128x512xbf16, #tpu.memory_space<vmem>>, vector<1x128x512xbf16>
    %129 = vector.shape_cast %128 : vector<1x128x512xbf16> to vector<128x512xbf16>
    %cst_48 = arith.constant dense<0.000000e+00> : vector<8x512xf32>
    %130 = tpu.matmul %127, %129, %cst_48 {dimension_numbers = #tpu.dot_dimension_numbers<[1], [0], [0], [1], [0, 0, 1, 1], [], []>} : vector<8x128xbf16>, vector<128x512xbf16>, vector<8x512xf32> -> vector<8x512xf32>
    %131 = vector.extract_strided_slice %130 {offsets = [0, 0], sizes = [8, 256], strides = [1, 1]} : vector<8x512xf32> to vector<8x256xf32>
    %132 = vector.extract_strided_slice %130 {offsets = [0, 256], sizes = [8, 256], strides = [1, 1]} : vector<8x512xf32> to vector<8x256xf32>
    %133 = arith.negf %131 : vector<8x256xf32>
    %134 = math.exp %133 : vector<8x256xf32>
    %cst_49 = arith.constant 1.000000e+00 : f32
    %135 = vector.broadcast %cst_49 : f32 to vector<8x256xf32>
    %136 = arith.addf %135, %134 : vector<8x256xf32>
    %137 = arith.divf %135, %136 : vector<8x256xf32>
    %138 = arith.mulf %131, %137 : vector<8x256xf32>
    %139 = arith.mulf %138, %132 : vector<8x256xf32>
    %140 = arith.truncf %139 : vector<8x256xf32> to vector<8x256xbf16>
    %c0_50 = arith.constant 0 : index
    %c0_51 = arith.constant 0 : index
    %c0_52 = arith.constant 0 : index
    %141 = vector.load %arg7[%c0_50, %c0_51, %c0_52] : memref<1x256x128xbf16, #tpu.memory_space<vmem>>, vector<1x256x128xbf16>
    %142 = vector.shape_cast %141 : vector<1x256x128xbf16> to vector<256x128xbf16>
    %cst_53 = arith.constant dense<0.000000e+00> : vector<8x128xf32>
    %143 = tpu.matmul %140, %142, %cst_53 {dimension_numbers = #tpu.dot_dimension_numbers<[1], [0], [0], [1], [0, 0, 1, 1], [], []>} : vector<8x256xbf16>, vector<256x128xbf16>, vector<8x128xf32> -> vector<8x128xf32>
    %144 = arith.addf %112, %143 : vector<8x128xf32>
    %c0_54 = arith.constant 0 : index
    %c0_55 = arith.constant 0 : index
    %145 = vector.load %arg13[%c0_54, %c0_55] : memref<8x128xf32, #tpu.memory_space<vmem>>, vector<8x128xf32>
    tpu.vector_store %arg13[%c0_54, %c0_55], %144 {strides = array<i32>} : memref<8x128xf32, #tpu.memory_space<vmem>>, vector<8x128xf32>,
    %c1_i32_56 = arith.constant 1 : i32
    %146 = arith.cmpi eq, %arg0, %c1_i32_56 : i32
    %147 = arith.extui %146 : i1 to i32
    %c0_i32_57 = arith.constant 0 : i32
    %148 = arith.cmpi ne, %147, %c0_i32_57 : i32
    scf.if %148 {
      %149 = vector.extract_strided_slice %144 {offsets = [7, 0], sizes = [1, 128], strides = [1, 1]} : vector<8x128xf32> to vector<1x128xf32>
      %c0_58 = arith.constant 0 : index
      %c0_59 = arith.constant 0 : index
      %150 = vector.load %arg10[%c0_58, %c0_59] : memref<1x128xf32, #tpu.memory_space<vmem>>, vector<1x128xf32>
      %151 = arith.mulf %149, %149 : vector<1x128xf32>
      %cst_60 = arith.constant dense<0.000000e+00> : vector<1xf32>
      %152 = vector.multi_reduction <add>, %151, %cst_60 [1] : vector<1x128xf32> to vector<1xf32>
      %153 = vector.shape_cast %152 : vector<1xf32> to vector<1x1xf32>
      %cst_61 = arith.constant 1.280000e+02 : f32
      %154 = vector.broadcast %cst_61 : f32 to vector<1x1xf32>
      %155 = arith.divf %153, %154 : vector<1x1xf32>
      %cst_62 = arith.constant 9.99999974E-6 : f32
      %156 = vector.broadcast %cst_62 : f32 to vector<1x1xf32>
      %157 = arith.addf %155, %156 : vector<1x1xf32>
      %158 = math.rsqrt %157 : vector<1x1xf32>
      %159 = vector.broadcast %158 : vector<1x1xf32> to vector<1x128xf32>
      %160 = arith.mulf %149, %159 : vector<1x128xf32>
      %161 = arith.mulf %160, %150 : vector<1x128xf32>
      %c0_63 = arith.constant 0 : index
      %c0_64 = arith.constant 0 : index
      %162 = vector.load %arg11[%c0_63, %c0_64] : memref<128x256xf32, #tpu.memory_space<vmem>>, vector<128x256xf32>
      %cst_65 = arith.constant dense<0.000000e+00> : vector<1x256xf32>
      %163 = tpu.matmul %161, %162, %cst_65 {dimension_numbers = #tpu.dot_dimension_numbers<[1], [0], [0], [1], [0, 0, 1, 1], [], []>} : vector<1x128xf32>, vector<128x256xf32>, vector<1x256xf32> -> vector<1x256xf32>
      %c0_66 = arith.constant 0 : index
      %c0_67 = arith.constant 0 : index
      %164 = vector.load %arg12[%c0_66, %c0_67] : memref<1x256xf32, #tpu.memory_space<vmem>>, vector<1x256xf32>
      tpu.vector_store %arg12[%c0_66, %c0_67], %163 {strides = array<i32>} : memref<1x256xf32, #tpu.memory_space<vmem>>, vector<1x256xf32>,
    } else {
    }
    return
  }
  func.func @transform_0(%arg0: i32) -> (i32, i32) {
    %c0_i32 = arith.constant 0 : i32
    %c0_i32_0 = arith.constant 0 : i32
    %c0_i32_1 = arith.constant 0 : i32
    return %c0_i32, %c0_i32_0 : i32, i32
  }
  func.func @transform_1(%arg0: i32) -> (i32, i32) {
    %c0_i32 = arith.constant 0 : i32
    %c0_i32_0 = arith.constant 0 : i32
    %c0_i32_1 = arith.constant 0 : i32
    return %c0_i32, %c0_i32_0 : i32, i32
  }
  func.func @transform_2(%arg0: i32) -> (i32, i32) {
    %c0_i32 = arith.constant 0 : i32
    %c0_i32_0 = arith.constant 0 : i32
    %c0_i32_1 = arith.constant 0 : i32
    return %c0_i32, %c0_i32_0 : i32, i32
  }
  func.func @transform_3(%arg0: i32) -> (i32, i32, i32) {
    %c0_i32 = arith.constant 0 : i32
    %c0_i32_0 = arith.constant 0 : i32
    %c0_i32_1 = arith.constant 0 : i32
    return %arg0, %c0_i32, %c0_i32_0 : i32, i32, i32
  }
  func.func @transform_4(%arg0: i32) -> (i32, i32, i32) {
    %c0_i32 = arith.constant 0 : i32
    %c0_i32_0 = arith.constant 0 : i32
    %c0_i32_1 = arith.constant 0 : i32
    return %arg0, %c0_i32, %c0_i32_0 : i32, i32, i32
  }
  func.func @transform_5(%arg0: i32) -> (i32, i32, i32) {
    %c0_i32 = arith.constant 0 : i32
    %c0_i32_0 = arith.constant 0 : i32
    %c0_i32_1 = arith.constant 0 : i32
    return %arg0, %c0_i32, %c0_i32_0 : i32, i32, i32
  }
  func.func @transform_6(%arg0: i32) -> (i32, i32, i32) {
    %c0_i32 = arith.constant 0 : i32
    %c0_i32_0 = arith.constant 0 : i32
    %c0_i32_1 = arith.constant 0 : i32
    return %arg0, %c0_i32, %c0_i32_0 : i32, i32, i32
  }
  func.func @transform_7(%arg0: i32) -> (i32, i32, i32) {
    %c0_i32 = arith.constant 0 : i32
    %c0_i32_0 = arith.constant 0 : i32
    %c0_i32_1 = arith.constant 0 : i32
    return %arg0, %c0_i32, %c0_i32_0 : i32, i32, i32
  }
  func.func @transform_8(%arg0: i32) -> (i32, i32, i32) {
    %c0_i32 = arith.constant 0 : i32
    %c0_i32_0 = arith.constant 0 : i32
    %c0_i32_1 = arith.constant 0 : i32
    return %arg0, %c0_i32, %c0_i32_0 : i32, i32, i32
  }
  func.func @transform_9(%arg0: i32) -> (i32, i32) {
    %c0_i32 = arith.constant 0 : i32
    %c0_i32_0 = arith.constant 0 : i32
    %c0_i32_1 = arith.constant 0 : i32
    return %c0_i32, %c0_i32_0 : i32, i32
  }
  func.func @transform_10(%arg0: i32) -> (i32, i32) {
    %c0_i32 = arith.constant 0 : i32
    %c0_i32_0 = arith.constant 0 : i32
    %c0_i32_1 = arith.constant 0 : i32
    return %c0_i32, %c0_i32_0 : i32, i32
  }
  func.func @transform_11(%arg0: i32) -> (i32, i32) {
    %c0_i32 = arith.constant 0 : i32
    %c0_i32_0 = arith.constant 0 : i32
    %c0_i32_1 = arith.constant 0 : i32
    return %c0_i32, %c0_i32_0 : i32, i32
  }
}

</mosaic_0001>

<bundles_post_ra>
// kernel: llama3_forward.1
= control target key start
LH: loop header
LB: loop body
LE: loop exit
PB: predicated region body
PF: predicated region fallthrough
CT: control target
= control target key end

     0   :  { %s4764_s0 = inlined_call_operand.hbm [shape: f32[8,128], index: 0, kind: input, shape index: {}]   ;;  %s4765_s1 = inlined_call_operand.hbm [shape: f32[8,128], index: 1, kind: input, shape index: {}]   ;;  %s4766_s2 = inlined_call_operand.hbm [shape: f32[8,128], index: 2, kind: input, shape index: {}]   ;;  %s4767_s3 = inlined_call_operand.hbm [shape: bf16[2,128,384], index: 3, kind: input, shape index: {}]   ;;  %s4768_s4 = inlined_call_operand.hbm [shape: bf16[2,128,128], index: 4, kind: input, shape index: {}]   ;;  %s4769_s5 = inlined_call_operand.hbm [shape: bf16[2,128,512], index: 5, kind: input, shape index: {}]   ;;  %s4770_s6 = inlined_call_operand.hbm [shape: bf16[2,256,128], index: 6, kind: input, shape index: {}]   ;;  %s4771_s7 = inlined_call_operand.hbm [shape: f32[2,1,128], index: 7, kind: input, shape index: {}]   ;;  %s4772_s8 = inlined_call_operand.hbm [shape: f32[2,1,128], index: 8, kind: input, shape index: {}]   ;;  %s4773_s9 = inlined_call_operand.hbm [shape: f32[1,128], index: 9, kind: input, shape index: {}]   ;;  %s4774_s10 = inlined_call_operand.hbm [shape: f32[128,256], index: 10, kind: input, shape index: {}]   ;;  %s4775_s11 = inlined_call_operand.hbm [shape: f32[1,256], index: 11, kind: output, shape index: {}]  }
   0x1   :  { %4798 = sst [smem:[#allocation34_spill]] %s4765_s1 }
   0x2   :  { %4799 = sst [smem:[#allocation35_spill]] %s4767_s3 }
   0x3   :  { %4800 = sst [smem:[#allocation36_spill]] %s4769_s5 }
   0x4   :  { %4801 = sst [smem:[#allocation37_spill]] %s4771_s7 }
   0x5   :  { %4802 = sst [smem:[#allocation38_spill]] %s4773_s9 }
   0x6   :  { %4803 = sst [smem:[#allocation39_spill]] %s4775_s11 }
   0x7   :  { %16 = vsyncpa [#allocation4], 0 }
   0x8   :  { %17 = vsyncpa [#allocation7], 0 }
   0x9   :  { %18 = vsyncpa [#allocation10], 0 }
   0xa   :  { %20 = vsyncpa [#allocation10 + $0x1], 0 }
   0xb   :  { %21 = vsyncpa [#allocation13], 0 }
   0xc   :  { %23 = vsyncpa [#allocation13 + $0x1], 0 }
   0xd   :  { %24 = vsyncpa [#allocation16], 0 }
   0xe   :  { %26 = vsyncpa [#allocation16 + $0x1], 0 }
   0xf   :  { %27 = vsyncpa [#allocation19], 0 }
  0x10   :  { %28 = vsyncpa [#allocation5], 0  ;;  %s3999_s17 = smov 0   ;;  %s4001_s18 = smov 0  }
  0x11   :  { %s4003_s19 = smov 0   ;;  %s4005_s20 = smov 0  }
  0x12 LB: > { %4804 = sst [smem:[#allocation29_spill]] %s3899_s18  ;;  %s4018_s21 = sadd.s32 4294967295, %s3907_s20   ;;  %s3907_s20 = sphi %s4005_s20, %s4844_s20   ;;  %s3903_s19 = sphi %s4003_s19, %s4847_s19   ;;  %s3899_s18 = sphi %s4001_s18, %s4846_s18   ;;  %s3895_s17 = sphi %s3999_s17, %s4845_s17  }
  0x13   : > { %4805 = sst [smem:[#allocation30_spill]] %s3903_s19  ;;  %p117_p0 = scmp.ne.s32.totalorder %s3899_s18, %s3895_s17 }
  0x14   : > { %p4776_p1 = scmp.eq.s32.totalorder %s4018_s21, 0  ;;  %p2911_p2 = scmp.ge.s32.totalorder %s3907_s20, 1 }
  0x15   : > { %p321_p3 = scmp.lt.s32.totalorder %s3907_s20, 3  ;;  %s3909_s24 = smov [#allocation6]  }
  0x16   : > { %p4027_p5 = por %p4776_p1, %p117_p0  ;;  %s345_s25 = sshll.u32 %s3909_s24, 4  ;;  %s346_s25 = int_to_ptr.vmem [resolvable:$true] %s345_s25 }
  0x17   : > { %p4031_p6 = pnand %p2911_p2, %p321_p3  ;;  %s3910_s26 = smov [#allocation18]  }
  0x18   : > { %s4806_s22 = scalar_select %p4027_p5, 1, 0 }
  0x19   : > { %s4808_s23 = scalar_select %p4031_p6, 1, 0 }
  0x1a   : > { %4807 = sst [smem:[#allocation31_spill]] %s4806_s22  ;;  %p3264_p7 = pneg %p4031_p6 }
  0x1b   : > { %s367_s27 = sshll.u32 %s3910_s26, 4  ;;  %s4046_s29 = sadd.s32 1, %s3907_s20   ;;  %s4043_s27 = int_to_ptr.vmem [resolvable:$true] %s367_s27 }
  0x1c   : > { %p4039_p8 = pnand %p3264_p7, %p4776_p1  ;;  %4810 = sst [smem:[#allocation32_spill]] %s4046_s29 }
  0x1d   : > { %s4811_s1 = sld [smem:[#allocation34_spill]] }
  0x1e   : > { %s4809_s28 = scalar_select %p4039_p8, 1, 0 }
  0x1f   : > { %p4058_p10 = pneg %p4039_p8 }
  0x21   : > { %s4812_s17 = scalar_select %p4058_p10, 1, 0 }
  0x23   : > { %s3503_s14 = scalar_lea.hbm %s4811_s1, 128 }
  0x24   : > { %p3504_p9 = scmp.ne.s32.totalorder %s4811_s1, %s3503_s14  ;;  %p3510_p13 = scmp.lt.u32.totalorder %s3503_s14, %s4811_s1 }
  0x26   : > { %p3506_p11 = pnand %p4058_p10, %p3504_p9 }
  0x28   : > { %p3507_p12 = pneg %p3506_p11 }
  0x2a   : > { %p3512_p0 = pnand %p3510_p13, %p3507_p12 }
  0x2c   : > { %3515 = shalt.err (!%p3512_p0)
}
  0x2d   : > { %s3516_s12 = scalar_lea.vmem %s346_s25, 128  ;;  %p3524_p4 = scmp.lt.s32.totalorder %s346_s25, %s346_s25 }
  0x2e   : > { %p3517_p2 = scmp.ne.s32.totalorder %s346_s25, %s3516_s12  ;;  %p3525_p1 = scmp.lt.s32.totalorder %s3516_s12, %s3516_s12 }
  0x30   : > { %p3519_p3 = pnand %p3517_p2, %p4058_p10  ;;  %p3526_p5 = por %p3525_p1, %p3524_p4 }
  0x32   : > { %p3520_p7 = pneg %p3519_p3 }
  0x34   : > { %p3527_p6 = pnand %p3526_p5, %p3520_p7 }
  0x36   : > { %3530 = shalt.err (!%p3527_p6)
}
  0x37   : > { %3270 = dma.hbm_to_vmem [thread:$0]  (!%p4039_p8), %s4811_s1, 128, %s346_s25, [#allocation7]  }
  0x38   : > { %s4813_s9 = sld [smem:[#allocation38_spill]] }
  0x3e   : > { %s3531_s24 = scalar_lea.hbm %s4813_s9, 16 }
  0x3f   : > { %p3532_p9 = scmp.ne.s32.totalorder %s4813_s9, %s3531_s24  ;;  %p3538_p4 = scmp.lt.u32.totalorder %s3531_s24, %s4813_s9 }
  0x41   : > { %p3534_p11 = pnand %p3532_p9, %p4058_p10 }
  0x43   : > { %p3535_p1 = pneg %p3534_p11 }
  0x45   : > { %p3540_p5 = pnand %p3538_p4, %p3535_p1 }
  0x47   : > { %3543 = shalt.err (!%p3540_p5)
}
  0x48   : > { %s3544_s25 = scalar_lea.vmem %s4043_s27, 16  ;;  %s3551_s30 = scalar_lea.vmem %s4043_s27, 32 }
  0x49   : > { %p3545_p6 = scmp.ne.s32.totalorder %s4043_s27, %s3544_s25  ;;  %p3552_p0 = scmp.lt.s32.totalorder %s4043_s27, %s4043_s27 }
  0x4a   : > { %p3553_p2 = scmp.lt.s32.totalorder %s3551_s30, %s3544_s25 }
  0x4b   : > { %p3547_p12 = pnand %p3545_p6, %p4058_p10 }
  0x4c   : > { %p3554_p3 = por %p3553_p2, %p3552_p0 }
  0x4d   : > { %p3548_p13 = pneg %p3547_p12 }
  0x4f   : > { %p3555_p7 = pnand %p3554_p3, %p3548_p13 }
  0x51   : > { %3558 = shalt.err (!%p3555_p7)
}
  0x52   : > { %3276 = dma.hbm_to_vmem [thread:$0]  (!%p4039_p8), %s4813_s9, 16, %s4043_s27, [#allocation19]  }
  0x53   : > { %s4814_s15 = ssub.s32 %s3907_s20, %s4046_s29  ;;  %s104_s14 = sadd.s32 1, %s3903_s19 }
  0x54   : > { %p102_p9 = scmp.eq.s32.totalorder %s4814_s15, 0  ;;  %p111_p11 = scmp.ne.s32.totalorder %s3903_s19, %s3899_s18 }
  0x55   : > { %p112_p1 = scmp.eq.s32.totalorder %s3907_s20, 0  ;;  %p3304_p5 = scmp.lt.s32.totalorder %s3907_s20, 2 }
  0x56   : > { %s4106_s16 = scalar_select %p102_p9, %s3903_s19, %s104_s14  }
  0x57   : > { %p113_p4 = por %p112_p1, %p111_p11  ;;  %s4110_s24 = sand.u32 1, %s3907_s20  }
  0x58   : > { %4815 = sst [smem:[#allocation33_spill]] %s4106_s16  ;;  %s4113_s26 = sand.u32 1, %s3903_s19  }
  0x59   : > { %s3225_s12 = smul.u32 192, %s4113_s26  ;;  %p4117_p6 = pnand %p3304_p5, %p113_p4 }
  0x5a   : > { %s3226_s25 = smul.u32 3072, %s3907_s20  ;;  %s4817_s3 = sld [smem:[#allocation35_spill]] }
  0x5b   : > { %s4816_s30 = scalar_select %p4117_p6, 1, 0 }
  0x5c   : > { %s395_s15 = scalar_lea.vmem [#allocation9], %s3225_s12  ;;  %p4133_p13 = pneg %p4117_p6 }
  0x5d   : > { %s402_s14 = sshll.u32 %s395_s15, 4  ;;  %s4126_s14 = int_to_ptr.vmem [resolvable:$true] %s402_s14 }
  0x5e   : > { %s4818_s16 = scalar_select %p4133_p13, 1, 0 }
  0x60   : > { %s4124_s13 = scalar_lea.hbm %s4817_s3, %s3226_s25  ;;  %s3564_s11 = scalar_lea.hbm %s4817_s3, 6144 }
  0x61   : > { %s3559_s9 = scalar_lea.hbm %s4124_s13, 3072  ;;  %p3565_p3 = scmp.lt.u32.totalorder %s4124_s13, %s4817_s3 }
  0x62   : > { %p3560_p12 = scmp.ne.s32.totalorder %s4124_s13, %s3559_s9  ;;  %p3566_p7 = scmp.lt.u32.totalorder %s3564_s11, %s3559_s9 }
  0x63   : > { %p3568_p11 = scmp.lt.u32.totalorder %s3559_s9, %s4124_s13 }
  0x64   : > { %p3562_p0 = pnand %p4133_p13, %p3560_p12  ;;  %p3567_p9 = por %p3566_p7, %p3565_p3 }
  0x66   : > { %p3563_p2 = pneg %p3562_p0  ;;  %p3569_p1 = por %p3568_p11, %p3567_p9 }
  0x68   : > { %p3570_p4 = pnand %p3569_p1, %p3563_p2 }
  0x6a   : > { %3573 = shalt.err (!%p3570_p4)
}
  0x6b   : > { %s3574_s1 = scalar_lea.vmem %s4126_s14, 3072  ;;  %s3911_s25 = smov [#allocation9]  }
  0x6c   : > { %p3575_p5 = scmp.ne.s32.totalorder %s4126_s14, %s3574_s1  ;;  %s3579_s27 = sshll.u32 %s3911_s25, 4  ;;  %s3580_s27 = int_to_ptr.vmem [resolvable:$false] %s3579_s27 }
  0x6d   : > { %s3581_s12 = scalar_lea.vmem %s3580_s27, 6144  ;;  %p3582_p8 = scmp.lt.s32.totalorder %s4126_s14, %s3580_s27 }
  0x6e   : > { %p3577_p12 = pnand %p3575_p5, %p4133_p13  ;;  %p3583_p10 = scmp.lt.s32.totalorder %s3581_s12, %s3574_s1 }
  0x70   : > { %p3578_p0 = pneg %p3577_p12  ;;  %p3584_p3 = por %p3583_p10, %p3582_p8 }
  0x72   : > { %p3585_p7 = pnand %p3584_p3, %p3578_p0 }
  0x74   : > { %3588 = shalt.err (!%p3585_p7)
}
  0x75   : > { %s3912_s9 = smov 192   ;;  %s3913_s11 = smov 12  }
  0x76   : > { %s4819_s15 = scalar_lea.sflag [#allocation10], %s4110_s24  ;;  %s2922_s25 = sshll.u32 %s4113_s26, 8 }
  0x77   : > { %3283 = dma.hbm_to_vmem [thread:$0]  (!%p4117_p6), %s4124_s13, 3072, %s4126_s14, %s4819_s15, %s3912_s9, %s3912_s9, %s3913_s11  }
  0x78   : > { %s3047_s3 = sshll.u32 %s3907_s20, 12  ;;  %s4820_s5 = sld [smem:[#allocation36_spill]] }
  0x79   : > { %s437_s19 = scalar_lea.vmem [#allocation12], %s2922_s25  ;;  %s4790_s22 = scalar_lea.sflag [#allocation13], %s4110_s24 }
  0x7a   : > { %s444_s29 = sshll.u32 %s437_s19, 4  ;;  %s4165_s29 = int_to_ptr.vmem [resolvable:$true] %s444_s29 }
  0x7e   : > { %s4163_s12 = scalar_lea.hbm %s4820_s5, %s3047_s3  ;;  %s3594_s9 = scalar_lea.hbm %s4820_s5, 8192 }
  0x7f   : > { %s3589_s18 = scalar_lea.hbm %s4163_s12, 4096  ;;  %p3595_p9 = scmp.lt.u32.totalorder %s4163_s12, %s4820_s5 }
  0x80   : > { %p3590_p8 = scmp.ne.s32.totalorder %s4163_s12, %s3589_s18  ;;  %p3596_p11 = scmp.lt.u32.totalorder %s3594_s9, %s3589_s18 }
  0x81   : > { %p3598_p4 = scmp.lt.u32.totalorder %s3589_s18, %s4163_s12 }
  0x82   : > { %p3592_p10 = pnand %p3590_p8, %p4133_p13  ;;  %p3597_p1 = por %p3596_p11, %p3595_p9 }
  0x84   : > { %p3593_p2 = pneg %p3592_p10  ;;  %p3599_p5 = por %p3598_p4, %p3597_p1 }
  0x86   : > { %p3600_p12 = pnand %p3599_p5, %p3593_p2 }
  0x88   : > { %3603 = shalt.err (!%p3600_p12)
}
  0x89   : > { %s3604_s19 = scalar_lea.vmem %s4165_s29, 4096  ;;  %s3914_s15 = smov [#allocation12]  }
  0x8a   : > { %p3605_p0 = scmp.ne.s32.totalorder %s4165_s29, %s3604_s19  ;;  %s3609_s25 = sshll.u32 %s3914_s15, 4  ;;  %s3610_s25 = int_to_ptr.vmem [resolvable:$false] %s3609_s25 }
  0x8b   : > { %s3611_s27 = scalar_lea.vmem %s3610_s25, 8192  ;;  %p3612_p8 = scmp.lt.s32.totalorder %s4165_s29, %s3610_s25 }
  0x8c   : > { %p3607_p3 = pnand %p3605_p0, %p4133_p13  ;;  %p3613_p10 = scmp.lt.s32.totalorder %s3611_s27, %s3604_s19 }
  0x8e   : > { %p3608_p7 = pneg %p3607_p3  ;;  %p3614_p9 = por %p3613_p10, %p3612_p8 }
  0x90   : > { %p3615_p11 = pnand %p3614_p9, %p3608_p7 }
  0x92   : > { %3618 = shalt.err (!%p3615_p11)
}
  0x93   : > { %s4791_s18 = smov 256   ;;  %s4794_s1 = smov 16  }
  0x94   : > { %3289 = dma.hbm_to_vmem [thread:$0]  (!%p4117_p6), %s4163_s12, 4096, %s4165_s29, %s4790_s22, %s4791_s18, %s4791_s18, %s4794_s1  }
  0x95   : > { %s2928_s13 = sshll.u32 %s3907_s20, 4  ;;  %s478_s14 = scalar_lea.vmem [#allocation15], %s4113_s26 }
  0x96   : > { %s485_s9 = sshll.u32 %s478_s14, 4  ;;  %s4821_s7 = sld [smem:[#allocation37_spill]]  ;;  %s486_s9 = int_to_ptr.vmem [resolvable:$true] %s485_s9 }
  0x97   : > { %s476_s15 = scalar_lea.sflag [#allocation16], %s4110_s24 }
  0x9c   : > { %s4201_s19 = scalar_lea.hbm %s4821_s7, %s2928_s13  ;;  %s3624_s27 = scalar_lea.hbm %s4821_s7, 32 }
  0x9d   : > { %s3619_s25 = scalar_lea.hbm %s4201_s19, 16  ;;  %p3625_p5 = scmp.lt.u32.totalorder %s4201_s19, %s4821_s7 }
  0x9e   : > { %p3620_p2 = scmp.ne.s32.totalorder %s4201_s19, %s3619_s25  ;;  %p3626_p12 = scmp.lt.u32.totalorder %s3624_s27, %s3619_s25 }
  0x9f   : > { %p3628_p3 = scmp.lt.u32.totalorder %s3619_s25, %s4201_s19 }
  0xa0   : > { %p3622_p1 = pnand %p3620_p2, %p4133_p13  ;;  %p3627_p0 = por %p3626_p12, %p3625_p5 }
  0xa2   : > { %p3623_p4 = pneg %p3622_p1  ;;  %p3629_p7 = por %p3628_p3, %p3627_p0 }
  0xa4   : > { %p3630_p8 = pnand %p3629_p7, %p3623_p4 }
  0xa6   : > { %3633 = shalt.err (!%p3630_p8)
}
  0xa7   : > { %s3634_s3 = scalar_lea.vmem %s486_s9, 16  ;;  %s3917_s11 = smov [#allocation15]  }
  0xa8   : > { %p3635_p10 = scmp.ne.s32.totalorder %s486_s9, %s3634_s3  ;;  %s3639_s18 = sshll.u32 %s3917_s11, 4  ;;  %s3640_s18 = int_to_ptr.vmem [resolvable:$false] %s3639_s18 }
  0xa9   : > { %s3641_s29 = scalar_lea.vmem %s3640_s18, 32  ;;  %p3642_p2 = scmp.lt.s32.totalorder %s486_s9, %s3640_s18 }
  0xaa   : > { %p3637_p9 = pnand %p3635_p10, %p4133_p13  ;;  %p3643_p1 = scmp.lt.s32.totalorder %s3641_s29, %s3634_s3 }
  0xac   : > { %p3638_p11 = pneg %p3637_p9  ;;  %p3644_p6 = por %p3643_p1, %p3642_p2 }
  0xae   : > { %p3645_p5 = pnand %p3644_p6, %p3638_p11 }
  0xb0   : > { %3648 = shalt.err (!%p3645_p5)
}
  0xb1   : > { %p4822_p12 = scmp.ne.s32.totalorder %s4816_s30, 0  ;;  %s4228_s12 = scalar_lea.hbm %s4772_s8, %s2928_s13 }
  0xb2   : > { %s3918_s27 = smov [#allocation3]   ;;  %s3919_s14 = smov [#allocation8]  }
  0xb3   : > { %3295 = dma.hbm_to_vmem [thread:$0]  (!%p4822_p12), %s4201_s19, 16, %s486_s9, %s476_s15  }
  0xb4   : > { %s334_s18 = sshll.u32 %s3918_s27, 4  ;;  %s356_s3 = sshll.u32 %s3919_s14, 4  ;;  %s335_s18 = int_to_ptr.vmem [resolvable:$true] %s334_s18  ;;  %s357_s3 = int_to_ptr.vmem [resolvable:$true] %s356_s3 }
  0xb5   : > { %s3649_s1 = scalar_lea.hbm %s4764_s0, 128  ;;  %p4823_p4 = scmp.ne.s32.totalorder %s4812_s17, 0 }
  0xb6   : > { %p3650_p6 = scmp.ne.s32.totalorder %s4764_s0, %s3649_s1  ;;  %p3656_p7 = scmp.lt.u32.totalorder %s3649_s1, %s4764_s0 }
  0xb8   : > { %p3652_p0 = pnand %p3650_p6, %p4823_p4 }
  0xba   : > { %p3653_p3 = pneg %p3652_p0 }
  0xbc   : > { %p3658_p8 = pnand %p3656_p7, %p3653_p3 }
  0xbe   : > { %3661 = shalt.err (!%p3658_p8)
}
  0xbf   : > { %s3662_s13 = scalar_lea.vmem %s335_s18, 128  ;;  %p3670_p2 = scmp.lt.s32.totalorder %s335_s18, %s335_s18 }
  0xc0   : > { %p3663_p10 = scmp.ne.s32.totalorder %s335_s18, %s3662_s13  ;;  %p3671_p1 = scmp.lt.s32.totalorder %s3662_s13, %s3662_s13 }
  0xc2   : > { %p3665_p9 = pnand %p3663_p10, %p4823_p4  ;;  %p3672_p5 = por %p3671_p1, %p3670_p2 }
  0xc4   : > { %p3666_p11 = pneg %p3665_p9 }
  0xc6   : > { %p3673_p12 = pnand %p3672_p5, %p3666_p11 }
  0xc8   : > { %3676 = shalt.err (!%p3673_p12)
}
  0xc9   : > { %p4824_p6 = scmp.ne.s32.totalorder %s4809_s28, 0  ;;  %s3677_s25 = scalar_lea.hbm %s4766_s2, 128 }
  0xca   : > { %p3678_p0 = scmp.ne.s32.totalorder %s4766_s2, %s3677_s25  ;;  %p3684_p12 = scmp.lt.u32.totalorder %s3677_s25, %s4766_s2 }
  0xcb   : > { %3267 = dma.hbm_to_vmem [thread:$0]  (!%p4824_p6), %s4764_s0, 128, %s335_s18, [#allocation4]  }
  0xcc   : > { %p3680_p3 = pnand %p3678_p0, %p4823_p4 }
  0xce   : > { %p3681_p7 = pneg %p3680_p3 }
  0xd0   : > { %p3686_p8 = pnand %p3684_p12, %p3681_p7 }
  0xd2   : > { %3689 = shalt.err (!%p3686_p8)
}
  0xd3   : > { %s3690_s9 = scalar_lea.vmem %s357_s3, 128  ;;  %p3698_p2 = scmp.lt.s32.totalorder %s357_s3, %s357_s3 }
  0xd4   : > { %p3691_p10 = scmp.ne.s32.totalorder %s357_s3, %s3690_s9  ;;  %p3699_p1 = scmp.lt.s32.totalorder %s3690_s9, %s3690_s9 }
  0xd6   : > { %p3693_p9 = pnand %p3691_p10, %p4823_p4  ;;  %p3700_p5 = por %p3699_p1, %p3698_p2 }
  0xd8   : > { %p3694_p11 = pneg %p3693_p9 }
  0xda   : > { %p3701_p13 = pnand %p3700_p5, %p3694_p11 }
  0xdc   : > { %3704 = shalt.err (!%p3701_p13)
}
  0xdd   : > { %3273 = dma.hbm_to_vmem [thread:$0]  (!%p4824_p6), %s4766_s2, 128, %s357_s3, [#allocation7]  }
  0xde   : > { %s3920_s13 = smov [#allocation20]   ;;  %s2919_s7 = sshll.u32 %s4113_s26, 6 }
  0xdf   : > { %s377_s5 = sshll.u32 %s3920_s13, 4  ;;  %s3705_s25 = scalar_lea.hbm %s4774_s10, 4096  ;;  %s378_s5 = int_to_ptr.vmem [resolvable:$true] %s377_s5 }
  0xe0   : > { %p3706_p13 = scmp.ne.s32.totalorder %s4774_s10, %s3705_s25  ;;  %p3712_p7 = scmp.lt.u32.totalorder %s3705_s25, %s4774_s10 }
  0xe2   : > { %p3708_p0 = pnand %p3706_p13, %p4823_p4 }
  0xe4   : > { %p3709_p3 = pneg %p3708_p0 }
  0xe6   : > { %p3714_p12 = pnand %p3712_p7, %p3709_p3 }
  0xe8   : > { %3717 = shalt.err (!%p3714_p12)
}
  0xe9   : > { %s3718_s3 = scalar_lea.vmem %s378_s5, 4096  ;;  %p3726_p11 = scmp.lt.s32.totalorder %s378_s5, %s378_s5 }
  0xea   : > { %p3719_p8 = scmp.ne.s32.totalorder %s378_s5, %s3718_s3  ;;  %p3727_p2 = scmp.lt.s32.totalorder %s3718_s3, %s3718_s3 }
  0xec   : > { %p3721_p10 = pnand %p3719_p8, %p4823_p4  ;;  %p3728_p1 = por %p3727_p2, %p3726_p11 }
  0xee   : > { %p3722_p9 = pneg %p3721_p10 }
  0xf0   : > { %p3729_p5 = pnand %p3728_p1, %p3722_p9 }
  0xf2   : > { %3732 = shalt.err (!%p3729_p5)
}
  0xf3   : > { %s4825_s9 = smov 16   ;;  %s4826_s18 = smov 256  }
  0xf4   : > { %3279 = dma.hbm_to_vmem [thread:$0]  (!%p4824_p6), %s4774_s10, 4096, %s378_s5, [#allocation19], %s4826_s18, %s4826_s18, %s4825_s9  }
  0xf5   : > { %s3046_s1 = sshll.u32 %s3907_s20, 10  ;;  %s416_s17 = scalar_lea.vmem [#allocation11], %s2919_s7 }
  0xf6   : > { %s423_s22 = sshll.u32 %s416_s17, 4  ;;  %s4292_s14 = scalar_lea.hbm %s4768_s4, %s3046_s1  ;;  %s4294_s22 = int_to_ptr.vmem [resolvable:$true] %s423_s22 }
  0xf7   : > { %s3733_s28 = scalar_lea.hbm %s4292_s14, 1024  ;;  %p4827_p13 = scmp.ne.s32.totalorder %s4818_s16, 0 }
  0xf8   : > { %p3734_p4 = scmp.ne.s32.totalorder %s4292_s14, %s3733_s28  ;;  %s3738_s7 = scalar_lea.hbm %s4768_s4, 2048 }
  0xf9   : > { %p3739_p6 = scmp.lt.u32.totalorder %s4292_s14, %s4768_s4  ;;  %p3740_p7 = scmp.lt.u32.totalorder %s3738_s7, %s3733_s28 }
  0xfa   : > { %p3736_p0 = pnand %p3734_p4, %p4827_p13  ;;  %p3742_p8 = scmp.lt.u32.totalorder %s3733_s28, %s4292_s14 }
  0xfb   : > { %p3741_p12 = por %p3740_p7, %p3739_p6 }
  0xfc   : > { %p3737_p3 = pneg %p3736_p0 }
  0xfd   : > { %p3743_p10 = por %p3742_p8, %p3741_p12 }
  0xff   : > { %p3744_p9 = pnand %p3743_p10, %p3737_p3 }
 0x101   : > { %3747 = shalt.err (!%p3744_p9)
}
 0x102   : > { %s3748_s9 = scalar_lea.vmem %s4294_s22, 1024  ;;  %s3921_s18 = smov [#allocation11]  }
 0x103   : > { %p3749_p11 = scmp.ne.s32.totalorder %s4294_s22, %s3748_s9  ;;  %s3753_s19 = sshll.u32 %s3921_s18, 4  ;;  %s3754_s19 = int_to_ptr.vmem [resolvable:$false] %s3753_s19 }
 0x104   : > { %s3755_s13 = scalar_lea.vmem %s3754_s19, 2048  ;;  %p3756_p5 = scmp.lt.s32.totalorder %s4294_s22, %s3754_s19 }
 0x105   : > { %p3751_p2 = pnand %p3749_p11, %p4827_p13  ;;  %p3757_p4 = scmp.lt.s32.totalorder %s3755_s13, %s3748_s9 }
 0x107   : > { %p3752_p1 = pneg %p3751_p2  ;;  %p3758_p0 = por %p3757_p4, %p3756_p5 }
 0x109   : > { %p3759_p6 = pnand %p3758_p0, %p3752_p1 }
 0x10b   : > { %3762 = shalt.err (!%p3759_p6)
}
 0x10c   : > { %s3922_s1 = smov 64   ;;  %s3923_s17 = smov 4  }
 0x10d   : > { %p4828_p3 = scmp.ne.s32.totalorder %s4816_s30, 0  ;;  %s4829_s25 = scalar_lea.sflag [#allocation10], %s4110_s24 }
 0x10e   : > { %s2925_s27 = sshll.u32 %s4113_s26, 7  ;;  %s3048_s28 = sshll.u32 %s3907_s20, 11 }
 0x10f   : > { %3286 = dma.hbm_to_vmem [thread:$0]  (!%p4828_p3), %s4292_s14, 1024, %s4294_s22, %s4829_s25, %s3922_s1, %s3922_s1, %s3923_s17  }
 0x110   : > { %s4327_s7 = scalar_lea.hbm %s4770_s6, %s3048_s28  ;;  %s458_s29 = scalar_lea.vmem [#allocation14], %s2925_s27 }
 0x111   : > { %s465_s3 = sshll.u32 %s458_s29, 4  ;;  %s495_s9 = scalar_lea.vmem [#allocation17], %s4113_s26  ;;  %s4329_s3 = int_to_ptr.vmem [resolvable:$true] %s465_s3 }
 0x112   : > { %s4332_s18 = sshll.u32 %s495_s9, 4  ;;  %s3763_s19 = scalar_lea.hbm %s4327_s7, 2048  ;;  %s503_s18 = int_to_ptr.vmem [resolvable:$true] %s4332_s18 }
 0x113   : > { %p3764_p7 = scmp.ne.s32.totalorder %s4327_s7, %s3763_s19  ;;  %s3768_s14 = scalar_lea.hbm %s4770_s6, 4096 }
 0x114   : > { %p3769_p10 = scmp.lt.u32.totalorder %s4327_s7, %s4770_s6  ;;  %p3770_p9 = scmp.lt.u32.totalorder %s3768_s14, %s3763_s19 }
 0x115   : > { %p3766_p12 = pnand %p3764_p7, %p4827_p13  ;;  %p3772_p2 = scmp.lt.u32.totalorder %s3763_s19, %s4327_s7 }
 0x116   : > { %p3771_p11 = por %p3770_p9, %p3769_p10 }
 0x117   : > { %p3767_p8 = pneg %p3766_p12 }
 0x118   : > { %p3773_p1 = por %p3772_p2, %p3771_p11 }
 0x11a   : > { %p3774_p5 = pnand %p3773_p1, %p3767_p8 }
 0x11c   : > { %3777 = shalt.err (!%p3774_p5)
}
 0x11d   : > { %s3778_s26 = scalar_lea.vmem %s4329_s3, 2048  ;;  %s3924_s27 = smov [#allocation14]  }
 0x11e   : > { %p3779_p4 = scmp.ne.s32.totalorder %s4329_s3, %s3778_s26  ;;  %s3783_s28 = sshll.u32 %s3924_s27, 4  ;;  %s3784_s28 = int_to_ptr.vmem [resolvable:$false] %s3783_s28 }
 0x11f   : > { %s3785_s5 = scalar_lea.vmem %s3784_s28, 4096  ;;  %p3786_p7 = scmp.lt.s32.totalorder %s4329_s3, %s3784_s28 }
 0x120   : > { %p3781_p0 = pnand %p3779_p4, %p4827_p13  ;;  %p3787_p12 = scmp.lt.s32.totalorder %s3785_s5, %s3778_s26 }
 0x122   : > { %p3782_p6 = pneg %p3781_p0  ;;  %p3788_p10 = por %p3787_p12, %p3786_p7 }
 0x124   : > { %p3789_p9 = pnand %p3788_p10, %p3782_p6 }
 0x126   : > { %3792 = shalt.err (!%p3789_p9)
}
 0x127   : > { %s4830_s11 = scalar_lea.sflag [#allocation13], %s4110_s24  ;;  %s3793_s29 = scalar_lea.hbm %s4228_s12, 16 }
 0x128   : > { %3292 = dma.hbm_to_vmem [thread:$0]  (!%p4828_p3), %s4327_s7, 2048, %s4329_s3, %s4830_s11, %s3922_s1, %s3922_s1, %s3923_s17  }
 0x129   : > { %p3794_p8 = scmp.ne.s32.totalorder %s4228_s12, %s3793_s29  ;;  %s3798_s20 = scalar_lea.hbm %s4772_s8, 32 }
 0x12a   : > { %p3799_p1 = scmp.lt.u32.totalorder %s4228_s12, %s4772_s8  ;;  %p3800_p5 = scmp.lt.u32.totalorder %s3798_s20, %s3793_s29 }
 0x12b   : > { %p3796_p11 = pnand %p3794_p8, %p4827_p13  ;;  %p3802_p0 = scmp.lt.u32.totalorder %s3793_s29, %s4228_s12 }
 0x12c   : > { %p3801_p4 = por %p3800_p5, %p3799_p1 }
 0x12d   : > { %p3797_p2 = pneg %p3796_p11 }
 0x12e   : > { %p3803_p6 = por %p3802_p0, %p3801_p4 }
 0x130   : > { %p3804_p7 = pnand %p3803_p6, %p3797_p2 }
 0x132   : > { %3807 = shalt.err (!%p3804_p7)
}
 0x133   : > { %s3808_s1 = scalar_lea.vmem %s503_s18, 16  ;;  %s3925_s17 = smov [#allocation17]  }
 0x134   : > { %p3809_p12 = scmp.ne.s32.totalorder %s503_s18, %s3808_s1  ;;  %s3813_s7 = sshll.u32 %s3925_s17, 4  ;;  %s3814_s7 = int_to_ptr.vmem [resolvable:$false] %s3813_s7 }
 0x135   : > { %s3815_s3 = scalar_lea.vmem %s3814_s7, 32  ;;  %p3816_p8 = scmp.lt.s32.totalorder %s503_s18, %s3814_s7 }
 0x136   : > { %p3811_p10 = pnand %p3809_p12, %p4827_p13  ;;  %p3817_p11 = scmp.lt.s32.totalorder %s3815_s3, %s3808_s1 }
 0x138   : > { %p3812_p9 = pneg %p3811_p10  ;;  %p3818_p3 = por %p3817_p11, %p3816_p8 }
 0x13a   : > { %p3819_p1 = pnand %p3818_p3, %p3812_p9 }
 0x13c   : > { %3822 = shalt.err (!%p3819_p1)
}
 0x13d   : > { %p4831_p5 = scmp.ne.s32.totalorder %s4816_s30, 0  ;;  %p4832_p2 = scmp.ne.s32.totalorder %s4808_s23, 0 }
 0x13e   : > { %p4833_p13 = scmp.eq.s32.totalorder (!%p4832_p2), %s4018_s21, 0 }
 0x13f   : > { %3298 = dma.hbm_to_vmem [thread:$0]  (!%p4831_p5), %s4228_s12, 16, %s503_s18, %s476_s15  }
 0x140   : > { %511 = sbr.rel (%p4832_p2) target bundleno = 3209 (0xc89), region = 64 }
 0x147   : > { %3866 = dma.done.wait (%p4833_p13), [#allocation4], 128   ;;  %p4834_p4 = pmov %p4833_p13 }
 0x149   : > { %3868 = vsyncadd (%p4834_p4), [#allocation4], 4294967168  ;;  %p4835_p0 = pmov %p4834_p4 }
 0x14b   : > { %3870 = dma.done.wait (%p4835_p0), [#allocation7], 256   ;;  %p4836_p3 = pmov %p4835_p0 }
 0x14c   : > { %s4837_s16 = sld [smem:[#allocation29_spill]]  ;;  %s4838_s24 = sld [smem:[#allocation31_spill]] }
 0x14d   : > { %3872 = vsyncadd (%p4836_p3), [#allocation7], 4294967040  ;;  %s525_s30 = sand.u32 1, %s4018_s21  }
 0x14e   : > { %s526_s12 = scalar_lea.sflag [#allocation10], %s525_s30 }
 0x152   : > { %s4392_s15 = sand.u32 1, %s4837_s16   ;;  %p4839_p6 = scmp.ne.s32.totalorder %s4838_s24, 0 }
 0x153   : > { %s3227_s23 = smul.u32 192, %s4392_s15 }
 0x155   : > { %s4395_s18 = scalar_lea.vmem [#allocation9], %s3227_s23 }
 0x156   : > { %3874 = dma.done.wait (%p4839_p6), %s526_s12, 4096  }
 0x157   : > { %3876 = vsyncadd (%p4839_p6), %s526_s12, 4294963200  ;;  %s2934_s13 = sshll.u32 %s4392_s15, 6  ;;  %s2935_s25 = sshll.u32 %s4392_s15, 8 }
 0x158   : > { %s4403_s26 = scalar_lea.vmem [#allocation11], %s2934_s13  ;;  %s544_s27 = scalar_lea.sflag [#allocation13], %s525_s30 }
 0x159   : > { %s4405_s28 = scalar_lea.vmem [#allocation12], %s2935_s25 }
 0x15a   : > { %3878 = dma.done.wait (%p4839_p6), %s544_s27, 6144  }
 0x15b   : > { %3880 = vsyncadd (%p4839_p6), %s544_s27, 4294961152  ;;  %s2936_s5 = sshll.u32 %s4392_s15, 7  ;;  %s562_s29 = scalar_lea.sflag [#allocation16], %s525_s30 }
 0x15c   : > { %s4412_s11 = scalar_lea.vmem [#allocation14], %s2936_s5  ;;  %s564_s9 = scalar_lea.vmem [#allocation15], %s4392_s15 }
 0x15d   : > { %3882 = dma.done.wait (%p4839_p6), %s562_s29, 32  }
 0x15e   : > { %3884 = vsyncadd (%p4839_p6), %s562_s29, 4294967264  ;;  %s572_s19 = scalar_lea.vmem [#allocation17], %s4392_s15  ;;  %p4840_p7 = pmov %p4835_p0 }
 0x15f   : > { %p4841_p12 = pmov %p4835_p0 }
 0x160   : > { %3886 = dma.done.wait (%p4840_p7), [#allocation19], 4112  }
 0x161   : > { %3888 = vsyncadd (%p4841_p12), [#allocation19], 4294963184  ;;  %p4842_p10 = scmp.ne.s32.totalorder %s4018_s21, 0 }
 0x162   : > { %v642_v0 = vld [vmem:[#allocation3] sm:$0xff] (!%p4842_p10) }
 0x163   : > { %641 = sbr.rel (%p4842_p10) target bundleno = 362 (0x16a), region = 112  ;;  %643 = vst [vmem:[#allocation2] sm:$0xff] (!%p4842_p10), %v642_v0 }
 0x16a PF: > { %v4426_v1 = vld [vmem:[#allocation2] sm:$0xff]  ;;  %v3926_v4 = vmov 0.0   ;;  %v3371_v6 = vld [vmem:[%s4395_s18 + $0x8] ss:$12 sps:$4 sm:$0xff]   ;;  %v3378_v11 = vld [vmem:[%s4395_s18 + $0x30] ss:$12 sps:$4 sm:$0xff]   ;;  %v905_v45 = vlaneseq }
 0x16b   : > { %v648_v2 = vmul.f32 %v4426_v1, %v4426_v1  ;;  %v3368_v3 = vld [vmem:[%s4395_s18 + $0x4] ss:$12 sps:$4 sm:$0xff]   ;;  %3105 = vmatprep.subr.bf16.mxu1 %v3926_v4  ;;  %v3370_v5 = vld [vmem:[%s4395_s18] ss:$12 sps:$4 sm:$0xff]   ;;  %v3372_v7 = vld [vmem:[%s4395_s18 + $0x1c] ss:$12 sps:$4 sm:$0xff]  }
 0x16c   : > { %824 = vmatprep.subr.bf16.mxu0 %v3368_v3  ;;  %v3374_v8 = vld [vmem:[%s4395_s18 + $0x18] ss:$12 sps:$4 sm:$0xff]   ;;  %3106 = vmatpush3.bf16.msra.mxu1 %v3371_v6  ;;  %v3375_v9 = vld [vmem:[%s4395_s18 + $0x20] ss:$12 sps:$4 sm:$0xff]   ;;  %v3382_v14 = vld [vmem:[%s4395_s18 + $0x48] ss:$12 sps:$4 sm:$0xff]  }
 0x16d   : > { %649 = vadd.xlane.f32.xlu0 %v648_v2  ;;  %825 = vmatpush1.bf16.msra.mxu0 %v3370_v5  ;;  %v3376_v10 = vld [vmem:[%s4395_s18 + $0x34] ss:$12 sps:$4 sm:$0xff]   ;;  %v3379_v12 = vld [vmem:[%s4395_s18 + $0x38] ss:$12 sps:$4 sm:$0xff]   ;;  %v3383_v15 = vld [vmem:[%s4395_s18 + $0x50] ss:$12 sps:$4 sm:$0xff]  }
 0x16e   : > { %826 = vmatprep.subr.bf16.mxu0 %v3372_v7  ;;  %3107 = vmatprep.subr.bf16.mxu1 %v3926_v4  ;;  %v3380_v13 = vld [vmem:[%s4395_s18 + $0x4c] ss:$12 sps:$4 sm:$0xff]   ;;  %v3384_v16 = vld [vmem:[%s4395_s18 + $0x64] ss:$12 sps:$4 sm:$0xff]   ;;  %v3387_v18 = vld [vmem:[%s4395_s18 + $0x68] ss:$12 sps:$4 sm:$0xff]  }
 0x16f   : > { %v3386_v17 = vld [vmem:[%s4395_s18 + $0x60] ss:$12 sps:$4 sm:$0xff]   ;;  %v3388_v19 = vld [vmem:[%s4395_s18 + $0x7c] ss:$12 sps:$4 sm:$0xff]   ;;  %v3390_v20 = vld [vmem:[%s4395_s18 + $0x78] ss:$12 sps:$4 sm:$0xff]  }
 0x170   : > { %3108 = vmatpush3.bf16.msra.mxu1 %v3375_v9  ;;  %v3391_v21 = vld [vmem:[%s4395_s18 + $0x80] ss:$12 sps:$4 sm:$0xff]   ;;  %v3394_v23 = vld [vmem:[%s4395_s18 + $0x90] ss:$12 sps:$4 sm:$0xff]   ;;  %v3395_v24 = vld [vmem:[%s4395_s18 + $0x98] ss:$12 sps:$4 sm:$0xff]  }
 0x171   : > { %827 = vmatpush1.bf16.msra.mxu0 %v3374_v8  ;;  %3109 = vmatprep.subr.bf16.mxu1 %v3926_v4  ;;  %v3392_v22 = vld [vmem:[%s4395_s18 + $0x94] ss:$12 sps:$4 sm:$0xff]   ;;  %v3927_v25 = vmov 0   ;;  %vm3928_vm0 = vmmov 0   ;;  %v3396_v26 = vld [vmem:[%s4395_s18 + $0xac] ss:$12 sps:$4 sm:$0xff]  }
 0x172   : > { %828 = vmatprep.subr.bf16.mxu0 %v3376_v10  ;;  %856 = vmatprep.mubr.bf16.mxu0 %v3927_v25  ;;  %v3398_v27 = vld [vmem:[%s4395_s18 + $0xa8] ss:$12 sps:$4 sm:$0xff]   ;;  %v3399_v28 = vld [vmem:[%s4395_s18 + $0xb0] ss:$12 sps:$4 sm:$0xff]   ;;  %v2940_v33 = vld [vmem:[%s564_s9] ss:$0 sm:$0xff] }
 0x173   : > { %3121 = vmatprep.mubr.msk.bf16.mxu1 %vm3928_vm0, %v3926_v4  ;;  %s3929_s20 = smov 16   ;;  %s3930_s22 = smov 112   ;;  %v4477_v46 = vand.u32 127, %v905_v45  ;;  %v645_v48 = vld [vmem:[#allocation6] sm:$0xff]  ;;  %v646_v49 = vld [vmem:[#allocation8] sm:$0xff]  ;;  %v4487_v5 = vshrl.u32 %v905_v45, 7 }
 0x174   : > { %3110 = vmatpush3.bf16.msra.mxu1 %v3379_v12  ;;  %s3931_s14 = smov 96   ;;  %s3932_s1 = smov 64   ;;  %v3934_v62 = vmov 1983009808   ;;  %vm1382_vm2 = vcmask 261120   ;;  %vm1578_vm4 = vcmask 64512  }
 0x175   : > { %829 = vmatpush1.bf16.msra.mxu0 %v3378_v11  ;;  %3111 = vmatprep.subr.bf16.mxu1 %v3926_v4  ;;  %v911_v47 = vand.u32 31, %v4477_v46  ;;  %s3933_s17 = smov 32   ;;  %v949_v63 = vunpack.c.l.s4 %v3934_v62  ;;  %vm1573_vm3 = vcmp.ge.s32.totalorder %v4487_v5, %v4477_v46  ;;  %vm1634_vm5 = vcmask 1043456   ;;  %p3040_p9 = scmp.ne.s32.totalorder %s4018_s21, 1 }
 0x176   : > { %830 = vmatprep.subr.bf16.mxu0 %v3380_v13  ;;  %vm1965_vm6 = vcmask 523264   ;;  %vm1967_vm7 = vcmask 785408   ;;  %vm2559_vm8 = vcmask (!%p3040_p9), 1047559   ;;  %vm2700_vm9 = vcmp.lt.s32.totalorder (!%p3040_p9), %v905_v45, 256 }
 0x177   : > { %vm919_vm1 = vcmp.lt.s32.totalorder %v911_v47, 16  ;;  %v950_v3 = vunpack.c.0.s8 %v949_v63 }
 0x178   : > { %3112 = vmatpush3.bf16.msra.mxu1 %v3383_v15 }
 0x179   : > { %831 = vmatpush1.bf16.msra.mxu0 %v3382_v14  ;;  %3113 = vmatprep.subr.bf16.mxu1 %v3926_v4  ;;  %v4490_v8 = vsub.s32 %v950_v3, %v4487_v5 }
 0x17a   : > { %832 = vmatprep.subr.bf16.mxu0 %v3384_v16 }
 0x17c   : > { %3114 = vmatpush3.bf16.msra.mxu1 %v3387_v18 }
 0x17d   : > { %833 = vmatpush1.bf16.msra.mxu0 %v3386_v17  ;;  %3115 = vmatprep.subr.bf16.mxu1 %v3926_v4 }
 0x17e   : > { %834 = vmatprep.subr.bf16.mxu0 %v3388_v19 }
 0x180   : > { %3116 = vmatpush3.bf16.msra.mxu1 %v3391_v21 }
 0x181   : > { %835 = vmatpush1.bf16.msra.mxu0 %v3390_v20  ;;  %3117 = vmatprep.subr.bf16.mxu1 %v3926_v4 }
 0x182   : > { %836 = vmatprep.subr.bf16.mxu0 %v3392_v22 }
 0x184   : > { %3118 = vmatpush3.bf16.msra.mxu1 %v3395_v24 }
 0x185   : > { %837 = vmatpush1.bf16.msra.mxu0 %v3394_v23  ;;  %3119 = vmatprep.subr.bf16.mxu1 %v3926_v4 }
 0x186   : > { %838 = vmatprep.subr.bf16.mxu0 %v3396_v26 }
 0x188   : > { %3120 = vmatpush3.bf16.msra.mxu1 %v3399_v28 }
 0x189   : > { %839 = vmatpush1.bf16.msra.mxu0 %v3398_v27  ;;  %3131 = vmatprep.subr.bf16.mxu1 %v3926_v4 }
 0x18a   : > { %3125 = vmatprep.subr.bf16.mxu0 %v3926_v4 }
 0x1fa   : > { %v650_v29 = vpop.xlane.xlu0 %649 }
 0x1fb   : > { %v652_v30 = vmul.f32 0.0078125, %v650_v29 }
 0x1fd   : > { %v653_v31 = vadd.f32 1e-05, %v652_v30 }
 0x1ff   : > { %3472 = vrsqrt.f32 %v653_v31 }
 0x209   : > { %v3473_v32 = vpop.eup %3472 }
 0x20a   : > { %v655_v34 = vmul.f32 %v3473_v32, %v4426_v1  ;;  %v3935_v1 = vmov 1934713408  }
 0x20b   : > { %v981_v2 = vunpack.c.l.s4 %v3935_v1 }
 0x20c   : > { %v662_v35 = vmul.f32 %v2940_v33, %v655_v34 }
 0x20d   : > { %v982_v7 = vunpack.c.0.s8 %v981_v2 }
 0x20e   : > { %v663_v36 = vpack.c.bf16 %v662_v35, %v662_v35 }
 0x20f   : > { %v4493_v14 = vsub.s32 %v982_v7, %v4487_v5 }
 0x210   : > { %857 = vmatmul.mubr.bf16.vlgmr.msra.gmra.mrb[0].mxu0 %v663_v36  ;;  %3122 = vmatmul.mubr.bf16.vlgmr.msra.gmra.mrb[0].mxu1 %v663_v36 }
 0x211   : > { %3127 = vmatprep.mubr.msk.bf16.mxu0 %vm3928_vm0, %v3926_v4  ;;  %3133 = vmatprep.mubr.msk.bf16.mxu1 %vm3928_vm0, %v3926_v4 }
 0x2e3   : > { %v858_v37 = vpop.f32.mrb[0].mxu0  ;;  %v4474_v38 = vpop.f32.mrb[0].mxu1 }
 0x2e4   : > { %v860_v39 = vpop.f32.mrb[1].mxu0  ;;  %v3123_v40 = vpop.f32.mrb[1].mxu1  ;;  %v925_v59 = vmul.f32 %v858_v37, %v645_v48 }
 0x2e5   : > { %v902_v41 = vpop.f32.mrb[2].mxu1  ;;  %930 = vrot.lane.b32.xlu1 %v860_v39, %s3929_s20  ;;  %928 = vrot.lane.b32.xlu0 %v860_v39, %s3930_s22  ;;  %v862_v42 = vpop.f32.mrb[2].mxu0  ;;  %v933_v53 = vmul.f32 %v860_v39, %v645_v48 }
 0x2e6   : > { %v863_v43 = vpop.f32.mrb[3].mxu0  ;;  %v3124_v44 = vpop.f32.mrb[3].mxu1 }
 0x2e9   : > { %920 = vrot.lane.b32.xlu1 %v858_v37, %s3930_s22 }
 0x2ed   : > { %922 = vrot.lane.b32.xlu1 %v858_v37, %s3929_s20 }
 0x357   : > { %v931_v50 = vpop.permute.xlu1 %930  ;;  %v929_v51 = vpop.permute.xlu0 %928 }
 0x358   : > { %v932_v52 = vsel %vm919_vm1, %v929_v51, %v931_v50 }
 0x359   : > { %v934_v54 = vmul.f32 %v932_v52, %v646_v49 }
 0x35b   : > { %v935_v55 = vadd.f32 %v934_v54, %v933_v53  ;;  %v921_v56 = vpop.permute.xlu1 %920 }
 0x35d   : > { %1083 = vrot.lane.b32.xlu1 %v935_v55, %s3931_s14 }
 0x35f   : > { %v923_v57 = vpop.permute.xlu1 %922 }
 0x360   : > { %v924_v58 = vsel %vm919_vm1, %v921_v56, %v923_v57 }
 0x361   : > { %v926_v60 = vmul.f32 %v924_v58, %v646_v49  ;;  %1086 = vrot.lane.b32.xlu1 %v935_v55, %s3932_s1 }
 0x363   : > { %v927_v61 = vadd.f32 %v926_v60, %v925_v59 }
 0x365   : > { %940 = vrot.lane.b32.xlu0 %v927_v61, %s3932_s1  ;;  %1089 = vrot.lane.b32.xlu1 %v935_v55, %s3933_s17 }
 0x369   : > { %937 = vrot.lane.b32.xlu1 %v927_v61, %s3931_s14 }
 0x36d   : > { %943 = vrot.lane.b32.xlu1 %v927_v61, %s3933_s17 }
 0x3cf   : > { %v1084_v0 = vpop.permute.xlu1 %1083 }
 0x3d3   : > { %v1087_v6 = vpop.permute.xlu1 %1086 }
 0x3d4   : > { %v1092_v9 = vcombine.low %v935_v55, %v1087_v6  ;;  %v1093_v10 = vcombine.high %v935_v55, %v1087_v6 }
 0x3d6   : > { %v1100_v15 = vrot.slane %v1092_v9, %v4490_v8  ;;  %v1107_v16 = vrot.slane %v1093_v10, %v4490_v8 }
 0x3d7   : > { %v1090_v11 = vpop.permute.xlu1 %1089  ;;  %v941_v20 = vpop.permute.xlu0 %940 }
 0x3d8   : > { %v1108_v12 = vcombine.low %v1084_v0, %v1090_v11  ;;  %v1109_v13 = vcombine.high %v1084_v0, %v1090_v11  ;;  %v946_v30 = vcombine.low %v927_v61, %v941_v20  ;;  %v947_v31 = vcombine.high %v927_v61, %v941_v20 }
 0x3da   : > { %v1116_v17 = vrot.slane %v1108_v12, %v4490_v8  ;;  %v1123_v18 = vrot.slane %v1109_v13, %v4490_v8  ;;  %v954_v44 = vrot.slane %v946_v30, %v4490_v8  ;;  %v961_v47 = vrot.slane %v947_v31, %v4490_v8 }
 0x3db   : > { %v938_v19 = vpop.permute.xlu1 %937 }
 0x3dc   : > { %v1124_v21 = vcombine.low %v1100_v15, %v1116_v17  ;;  %v1125_v22 = vcombine.high %v1100_v15, %v1116_v17  ;;  %v1140_v23 = vcombine.low %v1107_v16, %v1123_v18  ;;  %v1141_v24 = vcombine.high %v1107_v16, %v1123_v18 }
 0x3de   : > { %v1132_v26 = vrot.slane %v1124_v21, %v4493_v14  ;;  %v1139_v27 = vrot.slane %v1125_v22, %v4493_v14  ;;  %v1148_v28 = vrot.slane %v1140_v23, %v4493_v14  ;;  %v1155_v29 = vrot.slane %v1141_v24, %v4493_v14 }
 0x3df   : > { %v944_v32 = vpop.permute.xlu1 %943 }
 0x3e0   : > { %v1160_v33 = vcombine.low %v1132_v26, %v1139_v27  ;;  %v2967_v34 = vcombine.high %v1132_v26, %v1139_v27  ;;  %v1176_v35 = vcombine.low %v1148_v28, %v1155_v29  ;;  %v2968_v36 = vcombine.high %v1148_v28, %v1155_v29 }
 0x3e1   : > { %v962_v37 = vcombine.low %v938_v19, %v944_v32  ;;  %v963_v39 = vcombine.high %v938_v19, %v944_v32 }
 0x3e2   : > { %v1167_v40 = vrot.slane %v1160_v33, %v4490_v8  ;;  %v1175_v41 = vrot.slane %v2967_v34, %v4490_v8  ;;  %v1183_v42 = vrot.slane %v1176_v35, %v4490_v8  ;;  %v1191_v43 = vrot.slane %v2968_v36, %v4490_v8 }
 0x3e3   : > { %v970_v48 = vrot.slane %v962_v37, %v4490_v8  ;;  %v977_v49 = vrot.slane %v963_v39, %v4490_v8 }
 0x3e4   : > { %v1192_v50 = vcombine.low %v1167_v40, %v1175_v41  ;;  %v1208_v51 = vcombine.low %v1183_v42, %v1191_v43  ;;  %v1193_v52 = vcombine.high %v1167_v40, %v1175_v41  ;;  %v1209_v53 = vcombine.high %v1183_v42, %v1191_v43 }
 0x3e5   : > { %v978_v54 = vcombine.low %v954_v44, %v970_v48  ;;  %v979_v55 = vcombine.high %v954_v44, %v970_v48  ;;  %v994_v56 = vcombine.low %v961_v47, %v977_v49  ;;  %v995_v57 = vcombine.high %v961_v47, %v977_v49 }
 0x3e6   : > { %v1200_v58 = vrot.slane %v1192_v50, %v4493_v14  ;;  %v1216_v59 = vrot.slane %v1208_v51, %v4493_v14  ;;  %v1207_v2 = vrot.slane %v1193_v52, %v4493_v14  ;;  %v1223_v3 = vrot.slane %v1209_v53, %v4493_v14 }
 0x3e7   : > { %v986_v60 = vrot.slane %v978_v54, %v4493_v14  ;;  %v993_v61 = vrot.slane %v979_v55, %v4493_v14  ;;  %v1002_v62 = vrot.slane %v994_v56, %v4493_v14  ;;  %v1009_v63 = vrot.slane %v995_v57, %v4493_v14 }
 0x3e8   : > { %v1224_v0 = vcombine.low %v1200_v58, %v1216_v59  ;;  %v1225_v1 = vcombine.high %v1200_v58, %v1216_v59  ;;  %v1226_v22 = vcombine.low %v1207_v2, %v1223_v3  ;;  %v1227_v23 = vcombine.high %v1207_v2, %v1223_v3 }
 0x3e9   : > { %v1014_v6 = vcombine.low %v986_v60, %v993_v61  ;;  %v2965_v7 = vcombine.high %v986_v60, %v993_v61  ;;  %v1030_v9 = vcombine.low %v1002_v62, %v1009_v63  ;;  %v2966_v10 = vcombine.high %v1002_v62, %v1009_v63 }
 0x3ea   : > { %v1378_v11 = vpack.c.bf16 %v1224_v0, %v1224_v0  ;;  %v1379_v12 = vpack.c.bf16 %v1225_v1, %v1225_v1  ;;  %v1380_v31 = vpack.c.bf16 %v1226_v22, %v1226_v22  ;;  %v1381_v32 = vpack.c.bf16 %v1227_v23, %v1227_v23 }
 0x3eb   : > { %v1021_v13 = vrot.slane %v1014_v6, %v4490_v8  ;;  %v1029_v15 = vrot.slane %v2965_v7, %v4490_v8  ;;  %v1037_v16 = vrot.slane %v1030_v9, %v4490_v8  ;;  %v1045_v17 = vrot.slane %v2966_v10, %v4490_v8 }
 0x3ec   : > { %v1387_v18 = vsel %vm1382_vm2, %v1378_v11, 0  ;;  %v1433_v19 = vsel %vm1382_vm2, %v1379_v12, 0  ;;  %v1479_v37 = vsel %vm1382_vm2, %v1380_v31, 0  ;;  %v1525_v39 = vsel %vm1382_vm2, %v1381_v32, 0 }
 0x3ed   : > { %v1046_v20 = vcombine.low %v1021_v13, %v1029_v15  ;;  %v1062_v21 = vcombine.low %v1037_v16, %v1045_v17  ;;  %3126 = vmatpush3.bf16.xpose.msra.mxu0 %v1387_v18  ;;  %3132 = vmatpush3.bf16.xpose.msra.mxu1 %v1433_v19  ;;  %v1047_v24 = vcombine.high %v1021_v13, %v1029_v15 }
 0x3ee   : > { %3137 = vmatprep.subr.bf16.mxu0 %v3926_v4  ;;  %v1063_v26 = vcombine.high %v1037_v16, %v1045_v17  ;;  %3143 = vmatprep.subr.bf16.mxu1 %v3926_v4 }
 0x3ef   : > { %v1054_v27 = vrot.slane %v1046_v20, %v4493_v14  ;;  %v1070_v28 = vrot.slane %v1062_v21, %v4493_v14  ;;  %v1061_v35 = vrot.slane %v1047_v24, %v4493_v14 }
 0x3f0   : > { %v1077_v36 = vrot.slane %v1063_v26, %v4493_v14 }
 0x3f1   : > { %v1078_v29 = vcombine.low %v1054_v27, %v1070_v28  ;;  %v1079_v30 = vcombine.high %v1054_v27, %v1070_v28 }
 0x3f2   : > { %v1080_v40 = vcombine.low %v1061_v35, %v1077_v36  ;;  %v1081_v41 = vcombine.high %v1061_v35, %v1077_v36 }
 0x3f3   : > { %v1374_v33 = vpack.c.bf16 %v1078_v29, %v1078_v29  ;;  %v1375_v34 = vpack.c.bf16 %v1079_v30, %v1079_v30 }
 0x3f4   : > { %v1376_v42 = vpack.c.bf16 %v1080_v40, %v1080_v40  ;;  %v1377_v43 = vpack.c.bf16 %v1081_v41, %v1081_v41 }
 0x3f5   : > { %3128 = vmatmul.mubr.msk.bf16.vlgmr.msra.gmra.mrb[4].mxu0 %vm1382_vm2, %v1374_v33  ;;  %3134 = vmatmul.mubr.msk.bf16.vlgmr.msra.gmra.mrb[4].mxu1 %vm1382_vm2, %v1375_v34 }
 0x3f6   : > { %3138 = vmatpush3.bf16.xpose.msra.mxu0 %v1479_v37  ;;  %3144 = vmatpush3.bf16.xpose.msra.mxu1 %v1525_v39 }
 0x3f7   : > { %3139 = vmatprep.mubr.msk.bf16.mxu0 %vm3928_vm0, %v3926_v4  ;;  %3145 = vmatprep.mubr.msk.bf16.mxu1 %vm3928_vm0, %v3926_v4 }
 0x3f8   : > { %3149 = vmatprep.subr.bf16.mxu0 %v3926_v4  ;;  %3155 = vmatprep.subr.bf16.mxu1 %v3926_v4 }
 0x3fd   : > { %3140 = vmatmul.mubr.msk.bf16.vlgmr.msra.gmra.mrb[8].mxu0 %vm1382_vm2, %v1376_v42  ;;  %3146 = vmatmul.mubr.msk.bf16.vlgmr.msra.gmra.mrb[8].mxu1 %vm1382_vm2, %v1377_v43 }
 0x3fe   : > { %3151 = vmatprep.mubr.msk.bf16.mxu0 %vm3928_vm0, %v3926_v4  ;;  %3157 = vmatprep.mubr.msk.bf16.mxu1 %vm3928_vm0, %v3926_v4 }
 0x4c8   : > { %v1423_v44 = vpop.f32.mrb[4].mxu0  ;;  %v1469_v47 = vpop.f32.mrb[4].mxu1 }
 0x4c9   : > { %v1567_v48 = vmul.f32 0.17677669, %v1423_v44  ;;  %v1568_v49 = vmul.f32 0.17677669, %v1469_v47  ;;  %v3129_v50 = vpop.f32.mrb[5].mxu0  ;;  %v3135_v51 = vpop.f32.mrb[5].mxu1 }
 0x4ca   : > { %v1426_v52 = vpop.f32.mrb[6].mxu0  ;;  %v1472_v53 = vpop.f32.mrb[6].mxu1 }
 0x4cb   : > { %v3130_v54 = vpop.f32.mrb[7].mxu0  ;;  %v3136_v55 = vpop.f32.mrb[7].mxu1  ;;  %v1575_v56 = vsel %vm1573_vm3, %v1568_v49, -1e+30  ;;  %v1574_v57 = vsel %vm1573_vm3, %v1567_v48, -1e+30 }
 0x4cc   : > { %v1582_v58 = vsel %vm1578_vm4, %v1575_v56, -inf  ;;  %v1579_v59 = vsel %vm1578_vm4, %v1574_v57, -inf }
 0x4cd   : > { %1583 = vmax.xlane.f32.xlu1 %v1582_v58  ;;  %1580 = vmax.xlane.f32.xlu0 %v1579_v59 }
 0x4d0   : > { %v1515_v60 = vpop.f32.mrb[8].mxu0  ;;  %v1561_v61 = vpop.f32.mrb[8].mxu1 }
 0x4d1   : > { %v1569_v62 = vmul.f32 0.17677669, %v1515_v60  ;;  %v1570_v63 = vmul.f32 0.17677669, %v1561_v61  ;;  %v3141_v0 = vpop.f32.mrb[9].mxu0  ;;  %v3147_v1 = vpop.f32.mrb[9].mxu1 }
 0x4d2   : > { %v1518_v2 = vpop.f32.mrb[10].mxu0  ;;  %v1564_v3 = vpop.f32.mrb[10].mxu1 }
 0x4d3   : > { %v3142_v6 = vpop.f32.mrb[11].mxu0  ;;  %v3148_v7 = vpop.f32.mrb[11].mxu1  ;;  %v1576_v9 = vsel %vm1573_vm3, %v1569_v62, -1e+30  ;;  %v1577_v11 = vsel %vm1573_vm3, %v1570_v63, -1e+30 }
 0x4d4   : > { %v1585_v10 = vsel %vm1578_vm4, %v1576_v9, -inf  ;;  %v1588_v12 = vsel %vm1578_vm4, %v1577_v11, -inf }
 0x4d5   : > { %1586 = vmax.xlane.f32.xlu0 %v1585_v10 }
 0x4d9   : > { %1589 = vmax.xlane.f32.xlu0 %v1588_v12 }
 0x4de   : > { %1229 = vrot.lane.b32.xlu1 %v4474_v38, %s3931_s14 }
 0x55a   : > { %v1584_v13 = vpop.xlane.xlu1 %1583  ;;  %v1581_v15 = vpop.xlane.xlu0 %1580 }
 0x55b   : > { %v1592_v16 = vsub.f32 %v1575_v56, %v1584_v13  ;;  %v1591_v17 = vsub.f32 %v1574_v57, %v1581_v15 }
 0x55d   : > { %v1597_v18 = vmul.f32 1.442695, %v1592_v16  ;;  %v1595_v19 = vmul.f32 1.442695, %v1591_v17 }
 0x55e   : > { %v1230_v34 = vpop.permute.xlu1 %1229 }
 0x55f   : > { %3474 = vpow2.f32 %v1597_v18 }
 0x560   : > { %3476 = vpow2.f32 %v1595_v19 }
 0x562   : > { %v1587_v23 = vpop.xlane.xlu0 %1586 }
 0x563   : > { %v1593_v27 = vsub.f32 %v1576_v9, %v1587_v23 }
 0x565   : > { %v1599_v29 = vmul.f32 1.442695, %v1593_v27 }
 0x566   : > { %v1590_v24 = vpop.xlane.xlu0 %1589 }
 0x567   : > { %v1594_v26 = vsub.f32 %v1577_v11, %v1590_v24 }
 0x569   : > { %v4567_v20 = vpop.eup %3474  ;;  %v1601_v28 = vmul.f32 1.442695, %v1594_v26 }
 0x56a   : > { %v4569_v21 = vpop.eup %3476  ;;  %v1606_v46 = vsel %vm1578_vm4, %v4567_v20, 0.0 }
 0x56b   : > { %v1603_v22 = vsel %vm1578_vm4, %v4569_v21, 0.0  ;;  %1607 = vadd.xlane.f32.xlu0 %v1606_v46  ;;  %3478 = vpow2.f32 %v1601_v28 }
 0x56c   : > { %1604 = vadd.xlane.f32.xlu1 %v1603_v22  ;;  %3480 = vpow2.f32 %v1599_v29 }
 0x575   : > { %v4579_v30 = vpop.eup %3478 }
 0x576   : > { %v4581_v31 = vpop.eup %3480  ;;  %v1612_v32 = vsel %vm1578_vm4, %v4579_v30, 0.0 }
 0x577   : > { %v1609_v33 = vsel %vm1578_vm4, %v4581_v31, 0.0 }
 0x57d   : > { %1235 = vrot.lane.b32.xlu1 %v4474_v38, %s3933_s17 }
 0x581   : > { %1232 = vrot.lane.b32.xlu0 %v4474_v38, %s3932_s1 }
 0x5a0   : > { %1613 = vadd.xlane.f32.xlu0 %v1612_v32 }
 0x5a1   : > { %1610 = vadd.xlane.f32.xlu1 %v1609_v33 }
 0x5f8   : > { %v1608_v35 = vpop.xlane.xlu0 %1607 }
 0x5f9   : > { %v1605_v36 = vpop.xlane.xlu1 %1604  ;;  %3482 = vrcp.f32 %v1608_v35 }
 0x5fa   : > { %3484 = vrcp.f32 %v1605_v36 }
 0x5fc   : > { %v1233_v37 = vpop.permute.xlu0 %1232 }
 0x5fd   : > { %v1236_v39 = vpop.permute.xlu1 %1235  ;;  %v1238_v40 = vcombine.low %v4474_v38, %v1233_v37  ;;  %v1239_v41 = vcombine.high %v4474_v38, %v1233_v37 }
 0x5fe   : > { %v1254_v42 = vcombine.low %v1230_v34, %v1236_v39  ;;  %v1255_v43 = vcombine.high %v1230_v34, %v1236_v39 }
 0x5ff   : > { %v1246_v44 = vrot.slane %v1238_v40, %v4490_v8  ;;  %v1253_v47 = vrot.slane %v1239_v41, %v4490_v8 }
 0x600   : > { %v1262_v48 = vrot.slane %v1254_v42, %v4490_v8  ;;  %v1269_v49 = vrot.slane %v1255_v43, %v4490_v8  ;;  %v3400_v42 = vld [vmem:[%s4403_s26] sm:$0xff]   ;;  %v3401_v43 = vld [vmem:[%s4403_s26 + $0x8] sm:$0xff]  }
 0x602   : > { %v1270_v50 = vcombine.low %v1246_v44, %v1262_v48  ;;  %v1271_v51 = vcombine.high %v1246_v44, %v1262_v48  ;;  %v1286_v52 = vcombine.low %v1253_v47, %v1269_v49  ;;  %v1287_v53 = vcombine.high %v1253_v47, %v1269_v49  ;;  %v3404_v44 = vld [vmem:[%s4403_s26 + $0x20] sm:$0xff]   ;;  %v3405_v47 = vld [vmem:[%s4403_s26 + $0x28] sm:$0xff]  }
 0x603   : > { %v3483_v10 = vpop.eup %3482 }
 0x604   : > { %v1278_v54 = vrot.slane %v1270_v50, %v4493_v14  ;;  %v1285_v38 = vrot.slane %v1271_v51, %v4493_v14  ;;  %v1294_v55 = vrot.slane %v1286_v52, %v4493_v14  ;;  %v1301_v56 = vrot.slane %v1287_v53, %v4493_v14  ;;  %v3485_v13 = vpop.eup %3484 }
 0x605   : > { %v1619_v19 = vmul.f32 %v3485_v13, %v4569_v21  ;;  %v1620_v46 = vmul.f32 %v3483_v10, %v4567_v20 }
 0x606   : > { %v1306_v57 = vcombine.low %v1278_v54, %v1285_v38  ;;  %v2969_v58 = vcombine.high %v1278_v54, %v1285_v38  ;;  %v1322_v59 = vcombine.low %v1294_v55, %v1301_v56  ;;  %v2970_v60 = vcombine.high %v1294_v55, %v1301_v56 }
 0x607   : > { %v1623_v29 = vpack.c.bf16 %v1619_v19, %v1619_v19  ;;  %v1624_v32 = vpack.c.bf16 %v1620_v46, %v1620_v46 }
 0x608   : > { %v1313_v61 = vrot.slane %v1306_v57, %v4490_v8  ;;  %v1321_v62 = vrot.slane %v2969_v58, %v4490_v8  ;;  %v1329_v63 = vrot.slane %v1322_v59, %v4490_v8  ;;  %v1337_v0 = vrot.slane %v2970_v60, %v4490_v8 }
 0x60a   : > { %v1338_v1 = vcombine.low %v1313_v61, %v1321_v62  ;;  %v1339_v2 = vcombine.high %v1313_v61, %v1321_v62  ;;  %v1354_v3 = vcombine.low %v1329_v63, %v1337_v0  ;;  %v1355_v6 = vcombine.high %v1329_v63, %v1337_v0 }
 0x60c   : > { %v1346_v7 = vrot.slane %v1338_v1, %v4493_v14  ;;  %v1353_v9 = vrot.slane %v1339_v2, %v4493_v14  ;;  %v1362_v11 = vrot.slane %v1354_v3, %v4493_v14  ;;  %v1369_v12 = vrot.slane %v1355_v6, %v4493_v14 }
 0x60e   : > { %v1370_v15 = vcombine.low %v1346_v7, %v1362_v11  ;;  %v1371_v16 = vcombine.high %v1346_v7, %v1362_v11  ;;  %v1372_v17 = vcombine.low %v1353_v9, %v1369_v12  ;;  %v1373_v18 = vcombine.high %v1353_v9, %v1369_v12 }
 0x610   : > { %v1627_v22 = vpack.c.bf16 %v1370_v15, %v1370_v15  ;;  %v1628_v23 = vpack.c.bf16 %v1371_v16, %v1371_v16  ;;  %v1629_v27 = vpack.c.bf16 %v1372_v17, %v1372_v17  ;;  %v1630_v28 = vpack.c.bf16 %v1373_v18, %v1373_v18  ;;  %v3406_v15 = vld [vmem:[%s4403_s26 + $0x30] sm:$0xff]  }
 0x612   : > { %v1636_v24 = vsel %vm1634_vm5, %v1627_v22, 0  ;;  %v1682_v26 = vsel %vm1634_vm5, %v1628_v23, 0  ;;  %v1728_v20 = vsel %vm1634_vm5, %v1629_v27, 0  ;;  %v1774_v21 = vsel %vm1634_vm5, %v1630_v28, 0 }
 0x613   : > { %3150 = vmatpush3.bf16.msra.mxu0 %v1636_v24  ;;  %3156 = vmatpush3.bf16.msra.mxu1 %v1682_v26  ;;  %v3407_v26 = vld [vmem:[%s4403_s26 + $0x38] sm:$0xff]  }
 0x614   : > { %3161 = vmatprep.subr.bf16.mxu0 %v3926_v4  ;;  %3167 = vmatprep.subr.bf16.mxu1 %v3926_v4 }
 0x616   : > { %3152 = vmatmul.mubr.msk.bf16.vlgmr.msra.gmra.mrb[12].mxu0 %vm1578_vm4, %v1623_v29  ;;  %3158 = vmatmul.mubr.msk.bf16.vlgmr.msra.gmra.mrb[12].mxu1 %vm1578_vm4, %v1624_v32 }
 0x617   : > { %3162 = vmatpush3.bf16.msra.mxu0 %v1728_v20  ;;  %3168 = vmatpush3.bf16.msra.mxu1 %v1774_v21 }
 0x618   : > { %3163 = vmatprep.mubr.msk.bf16.mxu0 %vm3928_vm0, %v3926_v4  ;;  %3169 = vmatprep.mubr.msk.bf16.mxu1 %vm3928_vm0, %v3926_v4 }
 0x619   : > { %3173 = vmatprep.subr.bf16.mxu0 %v3926_v4 }
 0x62d   : > { %v1614_v33 = vpop.xlane.xlu0 %1613 }
 0x62e   : > { %v1611_v34 = vpop.xlane.xlu1 %1610  ;;  %3486 = vrcp.f32 %v1614_v33 }
 0x62f   : > { %3488 = vrcp.f32 %v1611_v34 }
 0x638   : > { %v3487_v35 = vpop.eup %3486 }
 0x639   : > { %v3489_v36 = vpop.eup %3488  ;;  %v1622_v37 = vmul.f32 %v3487_v35, %v4579_v30  ;;  %v3402_v30 = vld [vmem:[%s4403_s26 + $0x10] sm:$0xff]  }
 0x63a   : > { %v1621_v39 = vmul.f32 %v3489_v36, %v4581_v31  ;;  %v3403_v31 = vld [vmem:[%s4403_s26 + $0x18] sm:$0xff]  }
 0x63b   : > { %v1626_v40 = vpack.c.bf16 %v1622_v37, %v1622_v37 }
 0x63c   : > { %v1625_v41 = vpack.c.bf16 %v1621_v39, %v1621_v39 }
 0x63d   : > { %3170 = vmatmul.mubr.msk.bf16.vlgmr.msra.gmra.mrb[16].mxu1 %vm1578_vm4, %v1626_v40 }
 0x63e   : > { %3164 = vmatmul.mubr.msk.bf16.vlgmr.msra.gmra.mrb[16].mxu0 %vm1578_vm4, %v1625_v41  ;;  %2315 = vmatprep.mubr.bf16.mxu1 %v3927_v25 }
 0x63f   : > { %3189 = vmatprep.mubr.msk.bf16.mxu0 %vm3928_vm0, %v3926_v4  ;;  %3174 = vmatpush3.bf16.msra.mxu0 %v3400_v42 }
 0x640   : > { %3175 = vmatprep.subr.bf16.mxu0 %v3926_v4 }
 0x643   : > { %3176 = vmatpush3.bf16.msra.mxu0 %v3401_v43 }
 0x644   : > { %3177 = vmatprep.subr.bf16.mxu0 %v3926_v4 }
 0x647   : > { %3178 = vmatpush3.bf16.msra.mxu0 %v3402_v30 }
 0x648   : > { %3179 = vmatprep.subr.bf16.mxu0 %v3926_v4 }
 0x64b   : > { %3180 = vmatpush3.bf16.msra.mxu0 %v3403_v31 }
 0x64c   : > { %3181 = vmatprep.subr.bf16.mxu0 %v3926_v4 }
 0x64f   : > { %3182 = vmatpush3.bf16.msra.mxu0 %v3404_v44 }
 0x650   : > { %3183 = vmatprep.subr.bf16.mxu0 %v3926_v4 }
 0x653   : > { %3184 = vmatpush3.bf16.msra.mxu0 %v3405_v47 }
 0x654   : > { %3185 = vmatprep.subr.bf16.mxu0 %v3926_v4 }
 0x657   : > { %3186 = vmatpush3.bf16.msra.mxu0 %v3406_v15  ;;  %v3438_v15 = vld [vmem:[%s4405_s28 + $0xa0] ss:$16 sps:$4 sm:$0xff]  }
 0x658   : > { %3187 = vmatprep.subr.bf16.mxu0 %v3926_v4 }
 0x65b   : > { %3188 = vmatpush3.bf16.msra.mxu0 %v3407_v26  ;;  %v3453_v26 = vld [vmem:[%s4405_s28 + $0xe8] ss:$16 sps:$4 sm:$0xff]  }
 0x6e9   : > { %v1672_v48 = vpop.f32.mrb[12].mxu0  ;;  %v1718_v49 = vpop.f32.mrb[12].mxu1 }
 0x6ea   : > { %v3153_v50 = vpop.f32.mrb[13].mxu0  ;;  %v3159_v51 = vpop.f32.mrb[13].mxu1 }
 0x6eb   : > { %v1675_v52 = vpop.f32.mrb[14].mxu0  ;;  %v1721_v53 = vpop.f32.mrb[14].mxu1  ;;  %v3411_v50 = vld [vmem:[%s4405_s28 + $0x8] ss:$16 sps:$4 sm:$0xff]   ;;  %v3413_v51 = vld [vmem:[%s4405_s28 + $0xc] ss:$16 sps:$4 sm:$0xff]  }
 0x6ec   : > { %v3154_v54 = vpop.f32.mrb[15].mxu0  ;;  %v3160_v38 = vpop.f32.mrb[15].mxu1  ;;  %v3416_v52 = vld [vmem:[%s4405_s28 + $0x24] ss:$16 sps:$4 sm:$0xff]   ;;  %v3419_v53 = vld [vmem:[%s4405_s28 + $0x2c] ss:$16 sps:$4 sm:$0xff]   ;;  %2324 = vmatprep.subr.bf16.mxu0 %v3413_v51 }
 0x6ed   : > { %v3414_v54 = vld [vmem:[%s4405_s28 + $0x20] ss:$16 sps:$4 sm:$0xff]   ;;  %v3417_v38 = vld [vmem:[%s4405_s28 + $0x28] ss:$16 sps:$4 sm:$0xff]  }
 0x710   : > { %v1810_v55 = vpop.f32.mrb[16].mxu1 }
 0x711   : > { %v1764_v56 = vpop.f32.mrb[16].mxu0  ;;  %v1832_v57 = vcombine.low %v1718_v49, %v1810_v55  ;;  %v1833_v58 = vcombine.high %v1718_v49, %v1810_v55  ;;  %v3171_v59 = vpop.f32.mrb[17].mxu1  ;;  %v3410_v49 = vld [vmem:[%s4405_s28 + $0x4] ss:$16 sps:$4 sm:$0xff]  }
 0x712   : > { %v1816_v60 = vcombine.low %v1672_v48, %v1764_v56  ;;  %v1817_v61 = vcombine.high %v1672_v48, %v1764_v56  ;;  %v3165_v62 = vpop.f32.mrb[17].mxu0  ;;  %v1813_v63 = vpop.f32.mrb[18].mxu1  ;;  %v3408_v48 = vld [vmem:[%s4405_s28] ss:$16 sps:$4 sm:$0xff]   ;;  %2283 = vmatprep.subr.bf16.mxu1 %v3410_v49  ;;  %v3422_v55 = vld [vmem:[%s4405_s28 + $0x44] ss:$16 sps:$4 sm:$0xff]  }
 0x713   : > { %v1840_v0 = vrot.slane %v1832_v57, %v4490_v8  ;;  %v1847_v1 = vrot.slane %v1833_v58, %v4490_v8  ;;  %v1767_v2 = vpop.f32.mrb[18].mxu0  ;;  %v3172_v3 = vpop.f32.mrb[19].mxu1  ;;  %2284 = vmatpush1.bf16.msra.mxu1 %v3408_v48  ;;  %v3425_v56 = vld [vmem:[%s4405_s28 + $0x4c] ss:$16 sps:$4 sm:$0xff]   ;;  %v3423_v57 = vld [vmem:[%s4405_s28 + $0x48] ss:$16 sps:$4 sm:$0xff]  }
 0x714   : > { %v1824_v6 = vrot.slane %v1816_v60, %v4490_v8  ;;  %v1831_v7 = vrot.slane %v1817_v61, %v4490_v8  ;;  %v3166_v9 = vpop.f32.mrb[19].mxu0  ;;  %2285 = vmatprep.subr.bf16.mxu1 %v3416_v52  ;;  %v3500_v59 = vld [vmem:[#allocation2] sm:$0xff]  ;;  %v3431_v2 = vld [vmem:[%s4405_s28 + $0x6c] ss:$16 sps:$4 sm:$0xff]  }
 0x715   : > { %v3426_v3 = vld [vmem:[%s4405_s28 + $0x60] ss:$16 sps:$4 sm:$0xff]   ;;  %v3434_v9 = vld [vmem:[%s4405_s28 + $0x84] ss:$16 sps:$4 sm:$0xff]   ;;  %v3471_v48 = vld [vmem:[%s4412_s11 + $0x38] sm:$0xff]  }
 0x716   : > { %v1848_v10 = vcombine.low %v1824_v6, %v1840_v0  ;;  %v1849_v11 = vcombine.high %v1824_v6, %v1840_v0  ;;  %v1864_v12 = vcombine.low %v1831_v7, %v1847_v1  ;;  %v1865_v13 = vcombine.high %v1831_v7, %v1847_v1  ;;  %v3428_v1 = vld [vmem:[%s4405_s28 + $0x64] ss:$16 sps:$4 sm:$0xff]   ;;  %v3429_v6 = vld [vmem:[%s4405_s28 + $0x68] ss:$16 sps:$4 sm:$0xff]   ;;  %v3432_v7 = vld [vmem:[%s4405_s28 + $0x80] ss:$16 sps:$4 sm:$0xff]  }
 0x717   : > { %2286 = vmatpush1.bf16.msra.mxu1 %v3414_v54 }
 0x718   : > { %v1856_v16 = vrot.slane %v1848_v10, %v4493_v14  ;;  %v1863_v17 = vrot.slane %v1849_v11, %v4493_v14  ;;  %v1872_v18 = vrot.slane %v1864_v12, %v4493_v14  ;;  %v1879_v19 = vrot.slane %v1865_v13, %v4493_v14  ;;  %2287 = vmatprep.subr.bf16.mxu1 %v3422_v55  ;;  %v3435_v10 = vld [vmem:[%s4405_s28 + $0x88] ss:$16 sps:$4 sm:$0xff]   ;;  %v3437_v11 = vld [vmem:[%s4405_s28 + $0x8c] ss:$16 sps:$4 sm:$0xff]   ;;  %v3440_v12 = vld [vmem:[%s4405_s28 + $0xa4] ss:$16 sps:$4 sm:$0xff]  }
 0x719   : > { %v3443_v13 = vld [vmem:[%s4405_s28 + $0xac] ss:$16 sps:$4 sm:$0xff]  }
 0x71a   : > { %v1884_v46 = vcombine.low %v1856_v16, %v1863_v17  ;;  %v2979_v22 = vcombine.high %v1856_v16, %v1863_v17  ;;  %v1900_v23 = vcombine.low %v1872_v18, %v1879_v19  ;;  %v2980_v24 = vcombine.high %v1872_v18, %v1879_v19  ;;  %v3441_v16 = vld [vmem:[%s4405_s28 + $0xa8] ss:$16 sps:$4 sm:$0xff]   ;;  %v3446_v17 = vld [vmem:[%s4405_s28 + $0xc4] ss:$16 sps:$4 sm:$0xff]   ;;  %v3449_v18 = vld [vmem:[%s4405_s28 + $0xcc] ss:$16 sps:$4 sm:$0xff]  }
 0x71b   : > { %v3444_v19 = vld [vmem:[%s4405_s28 + $0xc0] ss:$16 sps:$4 sm:$0xff]  }
 0x71c   : > { %v1891_v27 = vrot.slane %v1884_v46, %v4490_v8  ;;  %v1899_v28 = vrot.slane %v2979_v22, %v4490_v8  ;;  %v1907_v29 = vrot.slane %v1900_v23, %v4490_v8  ;;  %v1915_v32 = vrot.slane %v2980_v24, %v4490_v8  ;;  %v3447_v46 = vld [vmem:[%s4405_s28 + $0xc8] ss:$16 sps:$4 sm:$0xff]   ;;  %v3452_v22 = vld [vmem:[%s4405_s28 + $0xe4] ss:$16 sps:$4 sm:$0xff]   ;;  %v3455_v23 = vld [vmem:[%s4405_s28 + $0xec] ss:$16 sps:$4 sm:$0xff]  }
 0x71d   : > { %v3450_v24 = vld [vmem:[%s4405_s28 + $0xe0] ss:$16 sps:$4 sm:$0xff]  }
 0x71e   : > { %v1917_v20 = vcombine.high %v1891_v27, %v1899_v28  ;;  %v1933_v21 = vcombine.high %v1907_v29, %v1915_v32  ;;  %v1916_v33 = vcombine.low %v1891_v27, %v1899_v28  ;;  %v1932_v34 = vcombine.low %v1907_v29, %v1915_v32 }
 0x720   : > { %v1931_v4 = vrot.slane %v1917_v20, %v4493_v14  ;;  %v1947_v35 = vrot.slane %v1933_v21, %v4493_v14  ;;  %v1924_v36 = vrot.slane %v1916_v33, %v4493_v14  ;;  %v1940_v37 = vrot.slane %v1932_v34, %v4493_v14  ;;  %v2989_v20 = vld [vmem:[%s572_s19] ss:$0 sm:$0xff] }
 0x722   : > { %v1950_v39 = vcombine.low %v1931_v4, %v1947_v35  ;;  %v1949_v40 = vcombine.high %v1924_v36, %v1940_v37  ;;  %v1951_v41 = vcombine.high %v1931_v4, %v1947_v35  ;;  %v1948_v42 = vcombine.low %v1924_v36, %v1940_v37  ;;  %v3456_v4 = vld [vmem:[%s4412_s11 + $0x40] sm:$0xff]   ;;  %v3458_v36 = vld [vmem:[%s4412_s11 + $0x48] sm:$0xff]  }
 0x723   : > { %v3457_v35 = vld [vmem:[%s4412_s11] sm:$0xff]   ;;  %v3459_v37 = vld [vmem:[%s4412_s11 + $0x8] sm:$0xff]  }
 0x724   : > { %1957 = vrot.lane.b32.xlu1 %v1950_v39, %s3932_s1  ;;  %1953 = vrot.lane.b32.xlu0 %v1949_v40, %s3933_s17  ;;  %v3460_v39 = vld [vmem:[%s4412_s11 + $0x50] sm:$0xff]  }
 0x725   : > { %v3461_v40 = vld [vmem:[%s4412_s11 + $0x10] sm:$0xff]  }
 0x728   : > { %1961 = vrot.lane.b32.xlu1 %v1951_v41, %s3931_s14  ;;  %v3462_v41 = vld [vmem:[%s4412_s11 + $0x58] sm:$0xff]  }
 0x796   : > { %v1958_v8 = vpop.permute.xlu1 %1957  ;;  %v1954_v43 = vpop.permute.xlu0 %1953 }
 0x797   : > { %v1964_v14 = vsel %vm1382_vm2, %v1948_v42, %v1954_v43  ;;  %v3463_v42 = vld [vmem:[%s4412_s11 + $0x18] sm:$0xff]   ;;  %v3465_v43 = vld [vmem:[%s4412_s11 + $0x20] sm:$0xff]  }
 0x798   : > { %v1966_v31 = vsel %vm1965_vm6, %v1964_v14, %v1958_v8  ;;  %v3464_v8 = vld [vmem:[%s4412_s11 + $0x60] sm:$0xff]   ;;  %v3466_v14 = vld [vmem:[%s4412_s11 + $0x68] sm:$0xff]  }
 0x79a   : > { %v1962_v30 = vpop.permute.xlu1 %1961 }
 0x79b   : > { %v1968_v44 = vsel %vm1967_vm7, %v1966_v31, %v1962_v30  ;;  %v3467_v30 = vld [vmem:[%s4412_s11 + $0x28] sm:$0xff]   ;;  %v3468_v31 = vld [vmem:[%s4412_s11 + $0x70] sm:$0xff]  }
 0x79c   : > { %v1969_v47 = vpack.c.bf16 %v1968_v44, %v1968_v44  ;;  %v3469_v44 = vld [vmem:[%s4412_s11 + $0x30] sm:$0xff]  }
 0x79e   : > { %3190 = vmatmul.mubr.bf16.vlgmr.msra.gmra.mrb[20].mxu0 %v1969_v47  ;;  %v3470_v47 = vld [vmem:[%s4412_s11 + $0x78] sm:$0xff]  }
 0x79f   : > { %2356 = vmatprep.mubr.bf16.mxu0 %v3927_v25  ;;  %2325 = vmatpush1.bf16.msra.mxu0 %v3411_v50  ;;  %v3420_v25 = vld [vmem:[%s4405_s28 + $0x40] ss:$16 sps:$4 sm:$0xff]  }
 0x7a0   : > { %2326 = vmatprep.subr.bf16.mxu0 %v3419_v53  ;;  %2288 = vmatpush1.bf16.msra.mxu1 %v3420_v25 }
 0x7a1   : > { %2289 = vmatprep.subr.bf16.mxu1 %v3428_v1 }
 0x7a3   : > { %2327 = vmatpush1.bf16.msra.mxu0 %v3417_v38 }
 0x7a4   : > { %2328 = vmatprep.subr.bf16.mxu0 %v3425_v56  ;;  %2290 = vmatpush1.bf16.msra.mxu1 %v3426_v3 }
 0x7a5   : > { %2291 = vmatprep.subr.bf16.mxu1 %v3434_v9 }
 0x7a7   : > { %2329 = vmatpush1.bf16.msra.mxu0 %v3423_v57 }
 0x7a8   : > { %2330 = vmatprep.subr.bf16.mxu0 %v3431_v2  ;;  %2292 = vmatpush1.bf16.msra.mxu1 %v3432_v7 }
 0x7a9   : > { %2293 = vmatprep.subr.bf16.mxu1 %v3440_v12 }
 0x7ab   : > { %2331 = vmatpush1.bf16.msra.mxu0 %v3429_v6 }
 0x7ac   : > { %2332 = vmatprep.subr.bf16.mxu0 %v3437_v11  ;;  %2294 = vmatpush1.bf16.msra.mxu1 %v3438_v15 }
 0x7ad   : > { %2295 = vmatprep.subr.bf16.mxu1 %v3446_v17  ;;  %v2575_v17 = vld [vmem:[#allocation20 + $0x8] sm:$0xff] (!%p3040_p9) }
 0x7af   : > { %2333 = vmatpush1.bf16.msra.mxu0 %v3435_v10 }
 0x7b0   : > { %2334 = vmatprep.subr.bf16.mxu0 %v3443_v13  ;;  %2296 = vmatpush1.bf16.msra.mxu1 %v3444_v19  ;;  %v2574_v19 = vld [vmem:[#allocation20] sm:$0xff] (!%p3040_p9) }
 0x7b1   : > { %2297 = vmatprep.subr.bf16.mxu1 %v3452_v22  ;;  %v2576_v22 = vld [vmem:[#allocation20 + $0x10] sm:$0xff] (!%p3040_p9) }
 0x7b3   : > { %2335 = vmatpush1.bf16.msra.mxu0 %v3441_v16 }
 0x7b4   : > { %2336 = vmatprep.subr.bf16.mxu0 %v3449_v18  ;;  %2298 = vmatpush1.bf16.msra.mxu1 %v3450_v24  ;;  %v2577_v18 = vld [vmem:[#allocation20 + $0x18] sm:$0xff] (!%p3040_p9) }
 0x7b5   : > { %3083 = vmatprep.subr.bf16.mxu1 %v3456_v4  ;;  %v2581_v24 = vld [vmem:[#allocation20 + $0x38] sm:$0xff] (!%p3040_p9)  ;;  %v2584_v4 = vld [vmem:[#allocation20 + $0x50] sm:$0xff] (!%p3040_p9) }
 0x7b7   : > { %2337 = vmatpush1.bf16.msra.mxu0 %v3447_v46  ;;  %v3193_v46 = vpack.c.bf16 (!%p3040_p9), %v2577_v18, %v2575_v17 }
 0x7b8   : > { %2338 = vmatprep.subr.bf16.mxu0 %v3455_v23  ;;  %v2579_v23 = vld [vmem:[#allocation20 + $0x28] sm:$0xff] (!%p3040_p9) }
 0x7bb   : > { %2339 = vmatpush1.bf16.msra.mxu0 %v3453_v26 }
 0x7bc   : > { %3194 = vmatprep.subr.bf16.mxu0 (!%p3040_p9), %v3193_v46 }
 0x871   : > { %v2068_v58 = vpop.f32.mrb[20].mxu0 }
 0x872   : > { %v4675_v60 = vadd.f32 %v3500_v59, %v2068_v58  ;;  %v3191_v61 = vpop.f32.mrb[21].mxu0 }
 0x873   : > { %v2071_v62 = vpop.f32.mrb[22].mxu0 }
 0x874   : > { %v3192_v63 = vpop.f32.mrb[23].mxu0  ;;  %v2076_v0 = vmul.f32 %v4675_v60, %v4675_v60 }
 0x876   : > { %2077 = vadd.xlane.f32.xlu0 %v2076_v0 }
 0x903   : > { %v2078_v27 = vpop.xlane.xlu0 %2077 }
 0x904   : > { %v2079_v28 = vmul.f32 0.0078125, %v2078_v27  ;;  %v3195_v27 = vpack.c.bf16 (!%p3040_p9), %v2576_v22, %v2574_v19 }
 0x906   : > { %v2080_v29 = vadd.f32 1e-05, %v2079_v28  ;;  %v2578_v28 = vld [vmem:[#allocation20 + $0x20] sm:$0xff] (!%p3040_p9) }
 0x908   : > { %3490 = vrsqrt.f32 %v2080_v29  ;;  %v2580_v29 = vld [vmem:[#allocation20 + $0x30] sm:$0xff] (!%p3040_p9) }
 0x912   : > { %v3491_v32 = vpop.eup %3490 }
 0x913   : > { %v2082_v21 = vmul.f32 %v3491_v32, %v4675_v60  ;;  %v2583_v32 = vld [vmem:[#allocation20 + $0x48] sm:$0xff] (!%p3040_p9) }
 0x915   : > { %v2089_v33 = vmul.f32 %v2989_v20, %v2082_v21  ;;  %v2585_v20 = vld [vmem:[#allocation20 + $0x58] sm:$0xff] (!%p3040_p9)  ;;  %v3199_v21 = vpack.c.bf16 (!%p3040_p9), %v2580_v29, %v2578_v28 }
 0x917   : > { %v2090_v34 = vpack.c.bf16 %v2089_v33, %v2089_v33  ;;  %v3201_v33 = vpack.c.bf16 (!%p3040_p9), %v2585_v20, %v2583_v32 }
 0x919   : > { %2316 = vmatmul.mubr.bf16.vlgmr.msra.gmra.mrb[20].mxu1 %v2090_v34  ;;  %2357 = vmatmul.mubr.bf16.vlgmr.msra.gmra.mrb[24].mxu0 %v2090_v34  ;;  %v2582_v34 = vld [vmem:[#allocation20 + $0x40] sm:$0xff] (!%p3040_p9) }
 0x91a   : > { %3084 = vmatpush3.bf16.msra.mxu1 %v3457_v35  ;;  %3196 = vmatpush1.bf16.msra.mxu0 (!%p3040_p9), %v3195_v27  ;;  %v3203_v35 = vpack.c.bf16 (!%p3040_p9), %v2584_v4, %v2582_v34 }
 0x91b   : > { %3085 = vmatprep.subr.bf16.mxu1 %v3458_v36  ;;  %v2587_v36 = vld [vmem:[#allocation20 + $0x68] sm:$0xff] (!%p3040_p9) }
 0x91e   : > { %3086 = vmatpush3.bf16.msra.mxu1 %v3459_v37  ;;  %v2589_v37 = vld [vmem:[#allocation20 + $0x78] sm:$0xff] (!%p3040_p9) }
 0x91f   : > { %3087 = vmatprep.subr.bf16.mxu1 %v3460_v39  ;;  %v3205_v39 = vpack.c.bf16 (!%p3040_p9), %v2589_v37, %v2587_v36 }
 0x922   : > { %3088 = vmatpush3.bf16.msra.mxu1 %v3461_v40  ;;  %v2586_v40 = vld [vmem:[#allocation20 + $0x60] sm:$0xff] (!%p3040_p9) }
 0x923   : > { %3089 = vmatprep.subr.bf16.mxu1 %v3462_v41  ;;  %v2588_v41 = vld [vmem:[#allocation20 + $0x70] sm:$0xff] (!%p3040_p9) }
 0x926   : > { %3090 = vmatpush3.bf16.msra.mxu1 %v3463_v42  ;;  %v3207_v42 = vpack.c.bf16 (!%p3040_p9), %v2588_v41, %v2586_v40 }
 0x927   : > { %3091 = vmatprep.subr.bf16.mxu1 %v3464_v8  ;;  %v2591_v8 = vld [vmem:[#allocation20 + $0x88] sm:$0xff] (!%p3040_p9) }
 0x92a   : > { %3092 = vmatpush3.bf16.msra.mxu1 %v3465_v43  ;;  %v2593_v43 = vld [vmem:[#allocation20 + $0x98] sm:$0xff] (!%p3040_p9) }
 0x92b   : > { %3093 = vmatprep.subr.bf16.mxu1 %v3466_v14  ;;  %v3209_v14 = vpack.c.bf16 (!%p3040_p9), %v2593_v43, %v2591_v8 }
 0x92e   : > { %3094 = vmatpush3.bf16.msra.mxu1 %v3467_v30  ;;  %v2590_v30 = vld [vmem:[#allocation20 + $0x80] sm:$0xff] (!%p3040_p9) }
 0x92f   : > { %3095 = vmatprep.subr.bf16.mxu1 %v3468_v31  ;;  %v2592_v31 = vld [vmem:[#allocation20 + $0x90] sm:$0xff] (!%p3040_p9) }
 0x932   : > { %3096 = vmatpush3.bf16.msra.mxu1 %v3469_v44  ;;  %v3211_v44 = vpack.c.bf16 (!%p3040_p9), %v2592_v31, %v2590_v30 }
 0x933   : > { %3097 = vmatprep.subr.bf16.mxu1 %v3470_v47  ;;  %v2595_v47 = vld [vmem:[#allocation20 + $0xa8] sm:$0xff] (!%p3040_p9) }
 0x936   : > { %3098 = vmatpush3.bf16.msra.mxu1 %v3471_v48  ;;  %v2597_v48 = vld [vmem:[#allocation20 + $0xb8] sm:$0xff] (!%p3040_p9) }
 0x9ec   : > { %v2317_v49 = vpop.f32.mrb[20].mxu1  ;;  %v2358_v50 = vpop.f32.mrb[24].mxu0 }
 0x9ed   : > { %v3022_v51 = vmul.f32 -1.442695, %v2317_v49  ;;  %v2319_v52 = vpop.f32.mrb[21].mxu1  ;;  %v2360_v53 = vpop.f32.mrb[25].mxu0 }
 0x9ee   : > { %v3023_v54 = vmul.f32 -1.442695, %v2319_v52  ;;  %v2321_v38 = vpop.f32.mrb[22].mxu1  ;;  %v2362_v55 = vpop.f32.mrb[26].mxu0 }
 0x9ef   : > { %3492 = vpow2.f32 %v3022_v51  ;;  %v2322_v56 = vpop.f32.mrb[23].mxu1  ;;  %v2363_v25 = vpop.f32.mrb[27].mxu0  ;;  %v2596_v51 = vld [vmem:[#allocation20 + $0xb0] sm:$0xff] (!%p3040_p9)  ;;  %v2598_v55 = vld [vmem:[#allocation20 + $0xc0] sm:$0xff] (!%p3040_p9) }
 0x9f0   : > { %3494 = vpow2.f32 %v3023_v54  ;;  %v2601_v54 = vld [vmem:[#allocation20 + $0xd8] sm:$0xff] (!%p3040_p9)  ;;  %v2600_v56 = vld [vmem:[#allocation20 + $0xd0] sm:$0xff] (!%p3040_p9) }
 0x9f1   : > { %v3219_v25 = vpack.c.bf16 (!%p3040_p9), %v2600_v56, %v2598_v55 }
 0x9f9   : > { %v3493_v57 = vpop.eup %3492 }
 0x9fa   : > { %v3495_v58 = vpop.eup %3494  ;;  %v2371_v59 = vadd.f32 1.0, %v3493_v57  ;;  %v2603_v57 = vld [vmem:[#allocation20 + $0xe8] sm:$0xff] (!%p3040_p9) }
 0x9fb   : > { %v2372_v61 = vadd.f32 1.0, %v3495_v58  ;;  %v2605_v58 = vld [vmem:[#allocation20 + $0xf8] sm:$0xff] (!%p3040_p9) }
 0x9fc   : > { %3496 = vrcp.f32 %v2371_v59  ;;  %v3221_v59 = vpack.c.bf16 (!%p3040_p9), %v2605_v58, %v2603_v57 }
 0x9fd   : > { %3498 = vrcp.f32 %v2372_v61  ;;  %v2602_v61 = vld [vmem:[#allocation20 + $0xe0] sm:$0xff] (!%p3040_p9) }
 0xa06   : > { %v3497_v62 = vpop.eup %3496 }
 0xa07   : > { %v3499_v63 = vpop.eup %3498  ;;  %v2377_v0 = vmul.f32 %v3497_v62, %v2317_v49  ;;  %v3213_v49 = vpack.c.bf16 (!%p3040_p9), %v2597_v48, %v2595_v47  ;;  %v2604_v62 = vld [vmem:[#allocation20 + $0xf0] sm:$0xff] (!%p3040_p9) }
 0xa08   : > { %v2378_v1 = vmul.f32 %v3499_v63, %v2319_v52  ;;  %v3223_v63 = vpack.c.bf16 (!%p3040_p9), %v2604_v62, %v2602_v61 }
 0xa09   : > { %v2379_v2 = vmul.f32 %v2377_v0, %v2358_v50  ;;  %v2594_v50 = vld [vmem:[#allocation20 + $0xa0] sm:$0xff] (!%p3040_p9)  ;;  %v3936_v0 = vmov (!%p3040_p9), 0.0  }
 0xa0a   : > { %v2380_v3 = vmul.f32 %v2378_v1, %v2360_v53  ;;  %v3215_v52 = vpack.c.bf16 (!%p3040_p9), %v2596_v51, %v2594_v50  ;;  %v2599_v53 = vld [vmem:[#allocation20 + $0xc8] sm:$0xff] (!%p3040_p9)  ;;  %2673 = vmatprep.mubr.f32.mxu0 (!%p3040_p9), %v3936_v0 }
 0xa0b   : > { %v2381_v7 = vpack.c.bf16 %v2379_v2, %v2379_v2  ;;  %v3217_v38 = vpack.c.bf16 (!%p3040_p9), %v2601_v54, %v2599_v53 }
 0xa0c   : > { %v2382_v6 = vpack.c.bf16 %v2380_v3, %v2380_v3 }
 0xa0e   : > { %2543 = vmatprep.mubr.bf16.mxu1 %v2382_v6 }
 0xa0f   : > { %2544 = vmatmul.mubr.bf16.vlgmr.msra.gmra.mrb[24].mxu1 %v2381_v7  ;;  %v3041_v7 = vld [vmem:[#allocation18] ss:$0 sm:$0xff] (!%p3040_p9) }
 0xae2   : > { %v3099_v9 = vpop.f32.mrb[24].mxu1  ;;  %2556 = sbr.rel (%p3040_p9) target bundleno = 3178 (0xc6a), region = 116 }
 0xae3   : > { %v3100_v10 = vpop.f32.mrb[25].mxu1 }
 0xae4   : > { %v3101_v11 = vadd.f32 %v3100_v10, %v3099_v9  ;;  %v3102_v12 = vpop.f32.mrb[26].mxu1 }
 0xae5   : > { %v3103_v13 = vpop.f32.mrb[27].mxu1  ;;  %v3937_v12 = vmov (!%p3040_p9), 1966171168  }
 0xae6   : > { %v4719_v15 = vadd.f32 %v3101_v11, %v4675_v60  ;;  %v3197_v60 = vpack.c.bf16 (!%p3040_p9), %v2581_v24, %v2579_v23  ;;  %v2684_v13 = vunpack.c.l.s4 (!%p3040_p9), %v3937_v12 }
 0xae8   : > { %2552 = vst [vmem:[#allocation2] sm:$0xff] %v4719_v15  ;;  %v2558_v16 = vmul.f32 (!%p3040_p9), %v4719_v15, %v4719_v15  ;;  %3198 = vmatprep.subr.bf16.mxu0 (!%p3040_p9), %v3197_v60 }
 0xae9   : > { %3200 = vmatpush1.bf16.msra.mxu0 %v3199_v21 }
 0xaea   : > { %v2560_v26 = vsel %vm2559_vm8, %v2558_v16, 0.0  ;;  %3202 = vmatprep.subr.bf16.mxu0 %v3201_v33  ;;  %v2685_v16 = vunpack.c.0.s8 %v2684_v13 }
 0xaeb   : > { %2561 = vadd.xlane.f32.xlu0 %v2560_v26 }
 0xaec   : > { %v2688_v18 = vsub.s32 %v2685_v16, %v4487_v5 }
 0xaed   : > { %3204 = vmatpush1.bf16.msra.mxu0 %v3203_v35 }
 0xaee   : > { %3206 = vmatprep.subr.bf16.mxu0 %v3205_v39 }
 0xaf1   : > { %3208 = vmatpush1.bf16.msra.mxu0 %v3207_v42 }
 0xaf2   : > { %3210 = vmatprep.subr.bf16.mxu0 %v3209_v14 }
 0xaf5   : > { %3212 = vmatpush1.bf16.msra.mxu0 %v3211_v44 }
 0xaf6   : > { %3214 = vmatprep.subr.bf16.mxu0 %v3213_v49 }
 0xaf9   : > { %3216 = vmatpush1.bf16.msra.mxu0 %v3215_v52 }
 0xafa   : > { %3218 = vmatprep.subr.bf16.mxu0 %v3217_v38 }
 0xafd   : > { %3220 = vmatpush1.bf16.msra.mxu0 %v3219_v25 }
 0xafe   : > { %3222 = vmatprep.subr.bf16.mxu0 %v3221_v59 }
 0xb01   : > { %3224 = vmatpush1.bf16.msra.mxu0 %v3223_v63 }
 0xb78   : > { %v2562_v1 = vpop.xlane.xlu0 %2561 }
 0xb79   : > { %v2563_v2 = vmul.f32 0.0078125, %v2562_v1 }
 0xb7b   : > { %v2564_v3 = vadd.f32 1e-05, %v2563_v2 }
 0xb7d   : > { %3501 = vrsqrt.f32 %v2564_v3 }
 0xb87   : > { %v3502_v6 = vpop.eup %3501 }
 0xb88   : > { %v2566_v9 = vmul.f32 %v3502_v6, %v4719_v15 }
 0xb8a   : > { %v2573_v10 = vmul.f32 %v3041_v7, %v2566_v9 }
 0xb8c   : > { %v2607_v11 = vrot.slane %v2573_v10, 7 }
 0xb8e   : > { %2674 = vmatmul.mubr.f32.vlgmr.msra.gmra.mrb[0].mxu0 %v2607_v11 }
 0xc61   : > { %v2675_v17 = vpop.f32.mrb[0].mxu0 }
 0xc62   : > { %v2677_v19 = vpop.f32.mrb[1].mxu0 }
 0xc63   : > { %v2682_v46 = vcombine.low %v2675_v17, %v2677_v19 }
 0xc65   : > { %v2689_v22 = vrot.slane %v2682_v46, %v2688_v18 }
 0xc67   : > { %v2696_v23 = vrot.slane %v2689_v22, %v2688_v18 }
 0xc69   : > { %2702 = vst.msk [vmem:[#allocation21] sm:$0x3] %vm2700_vm9, %v2696_v23 }
 0xc6a PF: > { %p3310_p8 = scmp.eq.s32.totalorder %s4018_s21, 1  ;;  %s3938_s7 = smov [#allocation21]  }
 0xc6b   : > { %s2710_s3 = sshll.u32 %s3938_s7, 4  ;;  %s2711_s3 = int_to_ptr.vmem [resolvable:$true] %s2710_s3 }
 0xc6c   : > { %s3823_s16 = scalar_lea.vmem %s2711_s3, 32  ;;  %p3830_p2 = scmp.lt.s32.totalorder %s2711_s3, %s2711_s3 }
 0xc6d   : > { %p3824_p11 = scmp.ne.s32.totalorder %s2711_s3, %s3823_s16  ;;  %p3831_p13 = scmp.lt.s32.totalorder %s3823_s16, %s3823_s16 }
 0xc6f   : > { %p3825_p1 = pnand %p3824_p11, %p3310_p8  ;;  %p3832_p4 = por %p3831_p13, %p3830_p2 }
 0xc71   : > { %p3826_p5 = pneg %p3825_p1 }
 0xc73   : > { %p3833_p0 = pnand %p3832_p4, %p3826_p5 }
 0xc75   : > { %3836 = shalt.err (!%p3833_p0)
}
 0xc76   : > { %s4843_s15 = sld [smem:[#allocation39_spill]] }
 0xc7c   : > { %s3837_s23 = scalar_lea.hbm %s4843_s15, 32 }
 0xc7d   : > { %p3838_p3 = scmp.ne.s32.totalorder %s4843_s15, %s3837_s23  ;;  %p3843_p12 = scmp.lt.u32.totalorder %s3837_s23, %s4843_s15 }
 0xc7f   : > { %p3839_p6 = pnand %p3838_p3, %p3310_p8 }
 0xc81   : > { %p3840_p7 = pneg %p3839_p6 }
 0xc83   : > { %p3845_p10 = pnand %p3843_p12, %p3840_p7 }
 0xc85   : > { %3848 = shalt.err (!%p3845_p10)
}
 0xc86   : > { %3261 = dma.vmem_to_hbm [thread:$0]  (%p3310_p8), %s2711_s3, 32, %s4843_s15, [#allocation5]  }
 0xc87   : > { %3890 = dma.done.wait (%p3310_p8), [#allocation5], 32  }
 0xc88   : > { %3892 = vsyncadd (%p3310_p8), [#allocation5], 4294967264 }
 0xc89 PF: > { %s4844_s20 = sld [smem:[#allocation32_spill]]  ;;  %s4845_s17 = sld [smem:[#allocation29_spill]] }
 0xc8a   : > { %s4846_s18 = sld [smem:[#allocation30_spill]]  ;;  %s4847_s19 = sld [smem:[#allocation33_spill]] }
 0xc8f   : > { %p31_p9 = scmp.ge.s32.totalorder %s4844_s20, 4  }
 0xc91   :  { %33 = sbr.rel (!%p31_p9) target bundleno = 18 (0x12), region = 189 }
 0xc98   :  { %2723 = vsyncpa [#allocation4], 1 }
 0xc99   :  { %2725 = vsyncpa [#allocation4 + $0x1], 1 }
 0xc9a   :  { %2726 = vsyncpa [#allocation7], 1 }
 0xc9b   :  { %2727 = vsyncpa [#allocation10], 1 }
 0xc9c   :  { %2729 = vsyncpa [#allocation10 + $0x1], 1 }
 0xc9d   :  { %2730 = vsyncpa [#allocation13], 1 }
 0xc9e   :  { %2732 = vsyncpa [#allocation13 + $0x1], 1 }
 0xc9f   :  { %2733 = vsyncpa [#allocation16], 1 }
 0xca0   :  { %2735 = vsyncpa [#allocation16 + $0x1], 1 }
 0xca1   :  { %2736 = vsyncpa [#allocation19], 1 }
 0xca2   :  { %2737 = vsyncpa [#allocation5], 1 }
 0xca3   :  { %2739 = vsyncpa [#allocation5 + $0x1], 1 }

</bundles_post_ra>
